<compile_context>
chip_gen: v5e
topology: v5e:2x2
jax: 0.10.0
libtpu: 0.0.40
codegen_flags: <defaults>
</compile_context>

<pallas_src>
import numpy as np
import jax
import jax.numpy as jnp
from jax.experimental import pallas as pl
from jax.experimental.pallas import tpu as pltpu


# ----------------------------------------------------------------------------
# Fused Pallas kernel: the entire autoencoder forward for the whole batch.
# ----------------------------------------------------------------------------
def _autoencoder_kernel(xT_ref, w1_ref, b1_ref, m2_ref, b2_ref,
                        m3_ref, b3_ref, m4t_ref, b4_ref, o_ref,
                        patch_ref, xb_ref, xd_ref):
    B, W, H = xT_ref.shape              # xT: (B, W, H) -- EEG channel H in lanes
    C1, KW = w1_ref.shape               # conv1 weight: (8, 64)
    Wp = m4t_ref.shape[1] // C1         # pooled width (2)
    Hd = m3_ref.shape[1] // C1          # deconv1 output height (128)
    S = 16                              # conv stride (module spec)

    # ---- gather conv1 input patches into (KW, B*2*Wp*H); H stays in lanes --
    for b in range(B):
        x_b = xT_ref[b]                                     # (W, H)
        for j in range(2 * Wp):                             # pre-pool positions
            col = (b * 2 * Wp + j) * H
            patch_ref[:, col:col + H] = x_b[S * j:S * j + KW, :]

    # ---- conv1 as ONE MXU dot over every (batch, position) patch ----------
    conv1 = jnp.dot(w1_ref[...], patch_ref[...],
                    preferred_element_type=jnp.float32)     # (C1, B*2*Wp*H)

    # ---- bias + relu + maxpool(1,2); lay out conv2 lhs rows=(b,p) cols=(c1,h)
    b1 = b1_ref[...]                                        # (C1, 1)
    for b in range(B):
        for p in range(Wp):
            lo = (b * 2 * Wp + 2 * p) * H
            y = jnp.maximum(jnp.maximum(conv1[:, lo:lo + H],
                                        conv1[:, lo + H:lo + 2 * H]) + b1,
                            0.0)                            # (C1, H)
            r = b * Wp + p
            for c in range(C1):
                xb_ref[r:r + 1, c * H:(c + 1) * H] = y[c:c + 1, :]

    # ---- conv2 + relu, deconv1 + relu: two chained GEMMs, stay resident ----
    zb = jnp.maximum(jnp.dot(xb_ref[...], m2_ref[...],
                             preferred_element_type=jnp.float32) + b2_ref[...],
                     0.0)                                   # (B*Wp, 16*H2)
    yc = jnp.maximum(jnp.dot(zb, m3_ref[...],
                             preferred_element_type=jnp.float32) + b3_ref[...],
                     0.0)                                   # (B*Wp, C1*Hd)

    # ---- re-tile for deconv2: xd rows=(c1',p), cols=(b,hd) -----------------
    for b in range(B):
        for c in range(C1):
            for p in range(Wp):
                xd_ref[c * Wp + p:c * Wp + p + 1, b * Hd:(b + 1) * Hd] = \
                    yc[b * Wp + p:b * Wp + p + 1, c * Hd:(c + 1) * Hd]

    # ---- deconv2 (Upsample folded into m4t); weight on the left so hd stays
    #      in lanes.  out rows = wd (padded to 128), cols = (b, hd). ---------
    out = jnp.maximum(jnp.dot(m4t_ref[...], xd_ref[...],
                              preferred_element_type=jnp.float32) + b4_ref[...],
                      0.0)                                  # (Wd_pad, B*Hd)
    for b in range(B):
        o_ref[b, :, :] = out[:, b * Hd:(b + 1) * Hd]        # lane-dense store


# ----------------------------------------------------------------------------
# Host-side (run once): unroll conv weights into dense GEMM operands.
# ----------------------------------------------------------------------------
def _conv_matrix(weight, bias, n_in, stride, positions):
    """1-D conv as a dense matrix.  weight: (C_out, C_in, K)."""
    C_out, C_in, K = weight.shape
    n_pos = len(positions)
    M = np.zeros((C_in * n_in, C_out * n_pos), np.float32)
    for co in range(C_out):
        for j, p in enumerate(positions):
            s = p * stride
            for ci in range(C_in):
                M[ci * n_in + s: ci * n_in + s + K, co * n_pos + j] = weight[co, ci, :]
    return M, np.repeat(bias.astype(np.float32), n_pos)


def _deconv_matrix(weight, bias, n_in, stride, n_out):
    """1-D transposed conv as a dense matrix.  weight: (C_in, C_out, K)."""
    C_in, C_out, K = weight.shape
    M = np.zeros((C_in * n_in, C_out * n_out), np.float32)
    for ci in range(C_in):
        for i in range(n_in):
            for co in range(C_out):
                M[ci * n_in + i,
                  co * n_out + i * stride: co * n_out + i * stride + K] = weight[ci, co, :]
    return M, np.repeat(bias.astype(np.float32), n_out)


def make_autoencoder(params, H, W):
    """Build the fused Pallas forward.  All Toeplitz unrolling happens here,
    once; the returned callable is jitted and contains only the pallas_call
    plus trivial NCHW <-> kernel-layout transposes/slices."""
    w1, b1, w2, b2, wd1, bd1, wd2, bd2 = [np.asarray(jax.device_get(p)) for p in params]

    C1 = w1.shape[0]                       # 8
    KW1 = w1.shape[3]                      # 64 (conv1 time kernel)
    KH2 = w2.shape[2]                      # 64 (conv2 channel kernel)
    KH3 = wd1.shape[2]                     # 64
    KW4 = wd2.shape[3]                     # 64
    S = 16
    W1 = (W - KW1) // S + 1                # conv1 width
    Wp = W1 // 2                           # after maxpool (1,2)
    H2 = (H - KH2) // S + 1                # conv2 height
    Hd = (H2 - 1) * S + KH3                # deconv1 height
    Wu = 2 * Wp                            # after Upsample (1,2)
    Wd = (Wu - 1) * S + KW4                # deconv2 width
    Wd_pad = ((Wd + 127) // 128) * 128     # lane-dense output store

    # conv1 weight used directly as a small (C1, KW1) GEMM operand.
    w1s = w1[:, 0, 0, :].astype(np.float32)
    b1s = b1.astype(np.float32).reshape(C1, 1)

    # conv2 / deconv1 as dense Toeplitz GEMM matrices.
    M2, bf2 = _conv_matrix(w2[:, :, :, 0], b2, H, S, list(range(H2)))   # (C1*H, 16*H2)
    M3, bf3 = _deconv_matrix(wd1[:, :, :, 0], bd1, H2, S, Hd)           # (16*H2, C1*Hd)

    # deconv2: fold Upsample(1,2) into the matrix (sum adjacent input rows),
    # zero-pad output columns to 128, and pre-transpose so the kernel's GEMM
    # keeps Hd in lanes (weight on the left).
    M4, _ = _deconv_matrix(wd2[:, :, 0, :], bd2, Wu, S, Wd)             # (C1*Wu, Wd)
    M4 = M4.reshape(C1, Wu, Wd)
    M4f = (M4[:, 0::2, :] + M4[:, 1::2, :]).reshape(C1 * Wp, Wd)        # upsample folded
    M4tp = np.zeros((Wd_pad, C1 * Wp), np.float32)
    M4tp[:Wd, :] = M4f.T
    bf4 = np.zeros((Wd_pad, 1), np.float32)
    bf4[:Wd, 0] = float(bd2[0])

    slabs = tuple(jnp.asarray(a) for a in
                  (w1s, b1s, M2, bf2.reshape(1, -1), M3, bf3.reshape(1, -1), M4tp, bf4))

    def fused(xT):
        B, _, Hx = xT.shape
        full = lambda s: pl.BlockSpec(s, lambda *i: (0,) * len(s))
        return pl.pallas_call(
            _autoencoder_kernel,
            out_shape=jax.ShapeDtypeStruct((B, Wd_pad, Hd), jnp.float32),
            grid=(1,),
            in_specs=[full(tuple(xT.shape))] + [full(tuple(a.shape)) for a in slabs],
            out_specs=full((B, Wd_pad, Hd)),
            scratch_shapes=[
                pltpu.VMEM((KW1, B * 2 * Wp * Hx), jnp.float32),   # conv1 patches
                pltpu.VMEM((B * Wp, C1 * Hx), jnp.float32),        # conv2 GEMM lhs
                pltpu.VMEM((C1 * Wp, B * Hd), jnp.float32),        # deconv2 GEMM rhs
            ],
            compiler_params=pltpu.CompilerParams(
                dimension_semantics=("arbitrary",)),
        )(xT, *slabs)

    @jax.jit
    def forward(x):
        # x: (B, 1, H, W) NCHW  ->  (B, 1, Hd, Wd)
        xT = jnp.transpose(x[:, 0, :, :], (0, 2, 1))        # (B, W, H): H in lanes
        o = fused(xT)                                        # (B, Wd_pad, Hd) = (b, wd, hd)
        o = jnp.transpose(o, (0, 2, 1))[:, :, :Wd]           # (B, Hd, Wd)
        return o[:, None, :, :]

    return forward


# ----------------------------------------------------------------------------
# Pure-numpy reference (direct convolution semantics, mirrors the PyTorch code)
# ----------------------------------------------------------------------------
def reference_forward(x, params):
    w1, b1, w2, b2, wd1, bd1, wd2, bd2 = [np.asarray(jax.device_get(p)) for p in params]
    x = np.asarray(jax.device_get(x))
    B, _, H, W = x.shape
    W1 = (W - 64) // 16 + 1
    y = np.zeros((B, 8, H, W1), np.float32)
    for w in range(W1):
        patch = x[:, 0, :, 16 * w:16 * w + 64]
        y[:, :, :, w] = np.einsum('bhk,ok->boh', patch, w1[:, 0, 0, :])
    y = np.maximum(y + b1[None, :, None, None], 0.0)
    Wp = W1 // 2
    y = y[:, :, :, :Wp * 2].reshape(B, 8, H, Wp, 2).max(-1)
    H2 = (H - 64) // 16 + 1
    z = np.zeros((B, 16, H2, Wp), np.float32)
    for h2 in range(H2):
        patch = y[:, :, 16 * h2:16 * h2 + 64, :]
        z[:, :, h2, :] = np.einsum('bckw,ock->bow', patch, w2[:, :, :, 0])
    z = np.maximum(z + b2[None, :, None, None], 0.0)
    Hd = (H2 - 1) * 16 + 64
    d = np.zeros((B, 8, Hd, Wp), np.float32)
    for h2 in range(H2):
        d[:, :, 16 * h2:16 * h2 + 64, :] += np.einsum('bcw,cok->bokw', z[:, :, h2, :], wd1[:, :, :, 0])
    d = np.maximum(d + bd1[None, :, None, None], 0.0)
    d = np.repeat(d, 2, axis=3)
    Wu = d.shape[3]
    Wd = (Wu - 1) * 16 + 64
    o = np.zeros((B, 1, Hd, Wd), np.float32)
    for wi in range(Wu):
        o[:, 0, :, 16 * wi:16 * wi + 64] += np.einsum('bch,ck->bhk', d[:, :, :, wi], wd2[:, 0, 0, :])
    o = np.maximum(o + bd2[None, :, None, None], 0.0)
    return o


# ----------------------------------------------------------------------------
if __name__ == "__main__":
    B, H, W = 2, 128, 128          # n_channels = 128 (module default), 128 time samples
    key = jax.random.PRNGKey(0)
    ks = jax.random.split(key, 9)

    params = (
        jax.random.normal(ks[0], (8, 1, 1, 64), jnp.float32) / np.sqrt(64.0),      # conv1.weight
        jax.random.normal(ks[1], (8,), jnp.float32) * 0.05,                         # conv1.bias
        jax.random.normal(ks[2], (16, 8, 64, 1), jnp.float32) / np.sqrt(8 * 64.0),  # conv2.weight
        jax.random.normal(ks[3], (16,), jnp.float32) * 0.05,                        # conv2.bias
        jax.random.normal(ks[4], (16, 8, 64, 1), jnp.float32) / np.sqrt(16 * 64.0), # deconv1.weight
        jax.random.normal(ks[5], (8,), jnp.float32) * 0.05,                         # deconv1.bias
        jax.random.normal(ks[6], (8, 1, 1, 64), jnp.float32) / np.sqrt(8 * 64.0),   # deconv2.weight
        jax.random.normal(ks[7], (1,), jnp.float32) * 0.05,                         # deconv2.bias
    )
    x = jax.random.normal(ks[8], (B, 1, H, W), jnp.float32)

    forward = make_autoencoder(params, H, W)   # host-side Toeplitz build, once
    out = jax.block_until_ready(forward(x))    # compile + run
    out = jax.block_until_ready(forward(x))    # steady-state call (no host rebuild)

    ref = reference_forward(x, params)
    assert out.shape == ref.shape, (out.shape, ref.shape)
    np.testing.assert_allclose(np.asarray(out), ref, rtol=2e-2, atol=2e-2)
    print("KERNEL_OK")
</pallas_src>

<mosaic_0001>
module attributes {stable_mosaic.version = 11 : i64} {
  func.func @_autoencoder_kernel(%arg0: i32, %arg1: memref<2x128x128xf32, #tpu.memory_space<vmem>>, %arg2: memref<8x64xf32, #tpu.memory_space<vmem>>, %arg3: memref<8x1xf32, #tpu.memory_space<vmem>>, %arg4: memref<1024x80xf32, #tpu.memory_space<vmem>>, %arg5: memref<1x80xf32, #tpu.memory_space<vmem>>, %arg6: memref<80x1024xf32, #tpu.memory_space<vmem>>, %arg7: memref<1x1024xf32, #tpu.memory_space<vmem>>, %arg8: memref<128x16xf32, #tpu.memory_space<vmem>>, %arg9: memref<128x1xf32, #tpu.memory_space<vmem>>, %arg10: memref<2x128x128xf32, #tpu.memory_space<vmem>>, %arg11: memref<64x1024xf32, #tpu.memory_space<vmem>>, %arg12: memref<4x1024xf32, #tpu.memory_space<vmem>>, %arg13: memref<16x256xf32, #tpu.memory_space<vmem>>) attributes {dimension_semantics = [#tpu.dimension_semantics<arbitrary>], iteration_bounds = array<i64: 1>, scalar_prefetch = 0 : i64, scratch_operands = 3 : i64, tpu.core_type = #tpu.core_type<tc>, window_params = [{pipeline_mode = #tpu.pipeline_mode<synchronous>, transform_indices = @transform_0, window_bounds = array<i64: 2, 128, 128>}, {pipeline_mode = #tpu.pipeline_mode<synchronous>, transform_indices = @transform_1, window_bounds = array<i64: 8, 64>}, {pipeline_mode = #tpu.pipeline_mode<synchronous>, transform_indices = @transform_2, window_bounds = array<i64: 8, 1>}, {pipeline_mode = #tpu.pipeline_mode<synchronous>, transform_indices = @transform_3, window_bounds = array<i64: 1024, 80>}, {pipeline_mode = #tpu.pipeline_mode<synchronous>, transform_indices = @transform_4, window_bounds = array<i64: 1, 80>}, {pipeline_mode = #tpu.pipeline_mode<synchronous>, transform_indices = @transform_5, window_bounds = array<i64: 80, 1024>}, {pipeline_mode = #tpu.pipeline_mode<synchronous>, transform_indices = @transform_6, window_bounds = array<i64: 1, 1024>}, {pipeline_mode = #tpu.pipeline_mode<synchronous>, transform_indices = @transform_7, window_bounds = array<i64: 128, 16>}, {pipeline_mode = #tpu.pipeline_mode<synchronous>, transform_indices = @transform_8, window_bounds = array<i64: 128, 1>}, {pipeline_mode = #tpu.pipeline_mode<synchronous>, transform_indices = @transform_9, window_bounds = array<i64: 2, 128, 128>}]} {
    %c0 = arith.constant 0 : index
    %c0_0 = arith.constant 0 : index
    %c0_1 = arith.constant 0 : index
    %0 = vector.load %arg1[%c0, %c0_0, %c0_1] : memref<2x128x128xf32, #tpu.memory_space<vmem>>, vector<1x128x128xf32>
    %1 = vector.shape_cast %0 : vector<1x128x128xf32> to vector<128x128xf32>
    %2 = vector.extract_strided_slice %1 {offsets = [0, 0], sizes = [64, 128], strides = [1, 1]} : vector<128x128xf32> to vector<64x128xf32>
    %c0_2 = arith.constant 0 : index
    %c0_3 = arith.constant 0 : index
    %3 = vector.load %arg11[%c0_2, %c0_3] : memref<64x1024xf32, #tpu.memory_space<vmem>>, vector<64x128xf32>
    tpu.vector_store %arg11[%c0_2, %c0_3], %2 {strides = array<i32>} : memref<64x1024xf32, #tpu.memory_space<vmem>>, vector<64x128xf32>,
    %4 = vector.extract_strided_slice %1 {offsets = [16, 0], sizes = [64, 128], strides = [1, 1]} : vector<128x128xf32> to vector<64x128xf32>
    %c0_4 = arith.constant 0 : index
    %c128 = arith.constant 128 : index
    %5 = vector.load %arg11[%c0_4, %c128] : memref<64x1024xf32, #tpu.memory_space<vmem>>, vector<64x128xf32>
    tpu.vector_store %arg11[%c0_4, %c128], %4 {strides = array<i32>} : memref<64x1024xf32, #tpu.memory_space<vmem>>, vector<64x128xf32>,
    %6 = vector.extract_strided_slice %1 {offsets = [32, 0], sizes = [64, 128], strides = [1, 1]} : vector<128x128xf32> to vector<64x128xf32>
    %c0_5 = arith.constant 0 : index
    %c256 = arith.constant 256 : index
    %7 = vector.load %arg11[%c0_5, %c256] : memref<64x1024xf32, #tpu.memory_space<vmem>>, vector<64x128xf32>
    tpu.vector_store %arg11[%c0_5, %c256], %6 {strides = array<i32>} : memref<64x1024xf32, #tpu.memory_space<vmem>>, vector<64x128xf32>,
    %8 = vector.extract_strided_slice %1 {offsets = [48, 0], sizes = [64, 128], strides = [1, 1]} : vector<128x128xf32> to vector<64x128xf32>
    %c0_6 = arith.constant 0 : index
    %c384 = arith.constant 384 : index
    %9 = vector.load %arg11[%c0_6, %c384] : memref<64x1024xf32, #tpu.memory_space<vmem>>, vector<64x128xf32>
    tpu.vector_store %arg11[%c0_6, %c384], %8 {strides = array<i32>} : memref<64x1024xf32, #tpu.memory_space<vmem>>, vector<64x128xf32>,
    %c1 = arith.constant 1 : index
    %c0_7 = arith.constant 0 : index
    %c0_8 = arith.constant 0 : index
    %10 = vector.load %arg1[%c1, %c0_7, %c0_8] : memref<2x128x128xf32, #tpu.memory_space<vmem>>, vector<1x128x128xf32>
    %11 = vector.shape_cast %10 : vector<1x128x128xf32> to vector<128x128xf32>
    %12 = vector.extract_strided_slice %11 {offsets = [0, 0], sizes = [64, 128], strides = [1, 1]} : vector<128x128xf32> to vector<64x128xf32>
    %c0_9 = arith.constant 0 : index
    %c512 = arith.constant 512 : index
    %13 = vector.load %arg11[%c0_9, %c512] : memref<64x1024xf32, #tpu.memory_space<vmem>>, vector<64x128xf32>
    tpu.vector_store %arg11[%c0_9, %c512], %12 {strides = array<i32>} : memref<64x1024xf32, #tpu.memory_space<vmem>>, vector<64x128xf32>,
    %14 = vector.extract_strided_slice %11 {offsets = [16, 0], sizes = [64, 128], strides = [1, 1]} : vector<128x128xf32> to vector<64x128xf32>
    %c0_10 = arith.constant 0 : index
    %c640 = arith.constant 640 : index
    %15 = vector.load %arg11[%c0_10, %c640] : memref<64x1024xf32, #tpu.memory_space<vmem>>, vector<64x128xf32>
    tpu.vector_store %arg11[%c0_10, %c640], %14 {strides = array<i32>} : memref<64x1024xf32, #tpu.memory_space<vmem>>, vector<64x128xf32>,
    %16 = vector.extract_strided_slice %11 {offsets = [32, 0], sizes = [64, 128], strides = [1, 1]} : vector<128x128xf32> to vector<64x128xf32>
    %c0_11 = arith.constant 0 : index
    %c768 = arith.constant 768 : index
    %17 = vector.load %arg11[%c0_11, %c768] : memref<64x1024xf32, #tpu.memory_space<vmem>>, vector<64x128xf32>
    tpu.vector_store %arg11[%c0_11, %c768], %16 {strides = array<i32>} : memref<64x1024xf32, #tpu.memory_space<vmem>>, vector<64x128xf32>,
    %18 = vector.extract_strided_slice %11 {offsets = [48, 0], sizes = [64, 128], strides = [1, 1]} : vector<128x128xf32> to vector<64x128xf32>
    %c0_12 = arith.constant 0 : index
    %c896 = arith.constant 896 : index
    %19 = vector.load %arg11[%c0_12, %c896] : memref<64x1024xf32, #tpu.memory_space<vmem>>, vector<64x128xf32>
    tpu.vector_store %arg11[%c0_12, %c896], %18 {strides = array<i32>} : memref<64x1024xf32, #tpu.memory_space<vmem>>, vector<64x128xf32>,
    %c0_13 = arith.constant 0 : index
    %c0_14 = arith.constant 0 : index
    %20 = vector.load %arg2[%c0_13, %c0_14] : memref<8x64xf32, #tpu.memory_space<vmem>>, vector<8x64xf32>
    %c0_15 = arith.constant 0 : index
    %c0_16 = arith.constant 0 : index
    %21 = vector.load %arg11[%c0_15, %c0_16] : memref<64x1024xf32, #tpu.memory_space<vmem>>, vector<64x1024xf32>
    %cst = arith.constant dense<0.000000e+00> : vector<8x1024xf32>
    %22 = tpu.matmul %20, %21, %cst {dimension_numbers = #tpu.dot_dimension_numbers<[1], [0], [0], [1], [0, 0, 1, 1], [], []>} : vector<8x64xf32>, vector<64x1024xf32>, vector<8x1024xf32> -> vector<8x1024xf32>
    %c0_17 = arith.constant 0 : index
    %c0_18 = arith.constant 0 : index
    %23 = vector.load %arg3[%c0_17, %c0_18] : memref<8x1xf32, #tpu.memory_space<vmem>>, vector<8x1xf32>
    %24 = vector.extract_strided_slice %22 {offsets = [0, 0], sizes = [8, 128], strides = [1, 1]} : vector<8x1024xf32> to vector<8x128xf32>
    %25 = vector.extract_strided_slice %22 {offsets = [0, 128], sizes = [8, 128], strides = [1, 1]} : vector<8x1024xf32> to vector<8x128xf32>
    %26 = arith.maximumf %24, %25 : vector<8x128xf32>
    %27 = vector.broadcast %23 : vector<8x1xf32> to vector<8x128xf32>
    %28 = arith.addf %26, %27 : vector<8x128xf32>
    %cst_19 = arith.constant 0.000000e+00 : f32
    %29 = vector.broadcast %cst_19 : f32 to vector<8x128xf32>
    %30 = arith.maximumf %28, %29 : vector<8x128xf32>
    %31 = vector.extract_strided_slice %30 {offsets = [0, 0], sizes = [1, 128], strides = [1, 1]} : vector<8x128xf32> to vector<1x128xf32>
    %c0_20 = arith.constant 0 : index
    %c0_21 = arith.constant 0 : index
    %32 = vector.load %arg12[%c0_20, %c0_21] : memref<4x1024xf32, #tpu.memory_space<vmem>>, vector<1x128xf32>
    tpu.vector_store %arg12[%c0_20, %c0_21], %31 {strides = array<i32>} : memref<4x1024xf32, #tpu.memory_space<vmem>>, vector<1x128xf32>,
    %33 = vector.extract_strided_slice %30 {offsets = [1, 0], sizes = [1, 128], strides = [1, 1]} : vector<8x128xf32> to vector<1x128xf32>
    %c0_22 = arith.constant 0 : index
    %c128_23 = arith.constant 128 : index
    %34 = vector.load %arg12[%c0_22, %c128_23] : memref<4x1024xf32, #tpu.memory_space<vmem>>, vector<1x128xf32>
    tpu.vector_store %arg12[%c0_22, %c128_23], %33 {strides = array<i32>} : memref<4x1024xf32, #tpu.memory_space<vmem>>, vector<1x128xf32>,
    %35 = vector.extract_strided_slice %30 {offsets = [2, 0], sizes = [1, 128], strides = [1, 1]} : vector<8x128xf32> to vector<1x128xf32>
    %c0_24 = arith.constant 0 : index
    %c256_25 = arith.constant 256 : index
    %36 = vector.load %arg12[%c0_24, %c256_25] : memref<4x1024xf32, #tpu.memory_space<vmem>>, vector<1x128xf32>
    tpu.vector_store %arg12[%c0_24, %c256_25], %35 {strides = array<i32>} : memref<4x1024xf32, #tpu.memory_space<vmem>>, vector<1x128xf32>,
    %37 = vector.extract_strided_slice %30 {offsets = [3, 0], sizes = [1, 128], strides = [1, 1]} : vector<8x128xf32> to vector<1x128xf32>
    %c0_26 = arith.constant 0 : index
    %c384_27 = arith.constant 384 : index
    %38 = vector.load %arg12[%c0_26, %c384_27] : memref<4x1024xf32, #tpu.memory_space<vmem>>, vector<1x128xf32>
    tpu.vector_store %arg12[%c0_26, %c384_27], %37 {strides = array<i32>} : memref<4x1024xf32, #tpu.memory_space<vmem>>, vector<1x128xf32>,
    %39 = vector.extract_strided_slice %30 {offsets = [4, 0], sizes = [1, 128], strides = [1, 1]} : vector<8x128xf32> to vector<1x128xf32>
    %c0_28 = arith.constant 0 : index
    %c512_29 = arith.constant 512 : index
    %40 = vector.load %arg12[%c0_28, %c512_29] : memref<4x1024xf32, #tpu.memory_space<vmem>>, vector<1x128xf32>
    tpu.vector_store %arg12[%c0_28, %c512_29], %39 {strides = array<i32>} : memref<4x1024xf32, #tpu.memory_space<vmem>>, vector<1x128xf32>,
    %41 = vector.extract_strided_slice %30 {offsets = [5, 0], sizes = [1, 128], strides = [1, 1]} : vector<8x128xf32> to vector<1x128xf32>
    %c0_30 = arith.constant 0 : index
    %c640_31 = arith.constant 640 : index
    %42 = vector.load %arg12[%c0_30, %c640_31] : memref<4x1024xf32, #tpu.memory_space<vmem>>, vector<1x128xf32>
    tpu.vector_store %arg12[%c0_30, %c640_31], %41 {strides = array<i32>} : memref<4x1024xf32, #tpu.memory_space<vmem>>, vector<1x128xf32>,
    %43 = vector.extract_strided_slice %30 {offsets = [6, 0], sizes = [1, 128], strides = [1, 1]} : vector<8x128xf32> to vector<1x128xf32>
    %c0_32 = arith.constant 0 : index
    %c768_33 = arith.constant 768 : index
    %44 = vector.load %arg12[%c0_32, %c768_33] : memref<4x1024xf32, #tpu.memory_space<vmem>>, vector<1x128xf32>
    tpu.vector_store %arg12[%c0_32, %c768_33], %43 {strides = array<i32>} : memref<4x1024xf32, #tpu.memory_space<vmem>>, vector<1x128xf32>,
    %45 = vector.extract_strided_slice %30 {offsets = [7, 0], sizes = [1, 128], strides = [1, 1]} : vector<8x128xf32> to vector<1x128xf32>
    %c0_34 = arith.constant 0 : index
    %c896_35 = arith.constant 896 : index
    %46 = vector.load %arg12[%c0_34, %c896_35] : memref<4x1024xf32, #tpu.memory_space<vmem>>, vector<1x128xf32>
    tpu.vector_store %arg12[%c0_34, %c896_35], %45 {strides = array<i32>} : memref<4x1024xf32, #tpu.memory_space<vmem>>, vector<1x128xf32>,
    %47 = vector.extract_strided_slice %22 {offsets = [0, 256], sizes = [8, 128], strides = [1, 1]} : vector<8x1024xf32> to vector<8x128xf32>
    %48 = vector.extract_strided_slice %22 {offsets = [0, 384], sizes = [8, 128], strides = [1, 1]} : vector<8x1024xf32> to vector<8x128xf32>
    %49 = arith.maximumf %47, %48 : vector<8x128xf32>
    %50 = vector.broadcast %23 : vector<8x1xf32> to vector<8x128xf32>
    %51 = arith.addf %49, %50 : vector<8x128xf32>
    %cst_36 = arith.constant 0.000000e+00 : f32
    %52 = vector.broadcast %cst_36 : f32 to vector<8x128xf32>
    %53 = arith.maximumf %51, %52 : vector<8x128xf32>
    %54 = vector.extract_strided_slice %53 {offsets = [0, 0], sizes = [1, 128], strides = [1, 1]} : vector<8x128xf32> to vector<1x128xf32>
    %c1_37 = arith.constant 1 : index
    %c0_38 = arith.constant 0 : index
    %55 = vector.load %arg12[%c1_37, %c0_38] : memref<4x1024xf32, #tpu.memory_space<vmem>>, vector<1x128xf32>
    tpu.vector_store %arg12[%c1_37, %c0_38], %54 {strides = array<i32>} : memref<4x1024xf32, #tpu.memory_space<vmem>>, vector<1x128xf32>,
    %56 = vector.extract_strided_slice %53 {offsets = [1, 0], sizes = [1, 128], strides = [1, 1]} : vector<8x128xf32> to vector<1x128xf32>
    %c1_39 = arith.constant 1 : index
    %c128_40 = arith.constant 128 : index
    %57 = vector.load %arg12[%c1_39, %c128_40] : memref<4x1024xf32, #tpu.memory_space<vmem>>, vector<1x128xf32>
    tpu.vector_store %arg12[%c1_39, %c128_40], %56 {strides = array<i32>} : memref<4x1024xf32, #tpu.memory_space<vmem>>, vector<1x128xf32>,
    %58 = vector.extract_strided_slice %53 {offsets = [2, 0], sizes = [1, 128], strides = [1, 1]} : vector<8x128xf32> to vector<1x128xf32>
    %c1_41 = arith.constant 1 : index
    %c256_42 = arith.constant 256 : index
    %59 = vector.load %arg12[%c1_41, %c256_42] : memref<4x1024xf32, #tpu.memory_space<vmem>>, vector<1x128xf32>
    tpu.vector_store %arg12[%c1_41, %c256_42], %58 {strides = array<i32>} : memref<4x1024xf32, #tpu.memory_space<vmem>>, vector<1x128xf32>,
    %60 = vector.extract_strided_slice %53 {offsets = [3, 0], sizes = [1, 128], strides = [1, 1]} : vector<8x128xf32> to vector<1x128xf32>
    %c1_43 = arith.constant 1 : index
    %c384_44 = arith.constant 384 : index
    %61 = vector.load %arg12[%c1_43, %c384_44] : memref<4x1024xf32, #tpu.memory_space<vmem>>, vector<1x128xf32>
    tpu.vector_store %arg12[%c1_43, %c384_44], %60 {strides = array<i32>} : memref<4x1024xf32, #tpu.memory_space<vmem>>, vector<1x128xf32>,
    %62 = vector.extract_strided_slice %53 {offsets = [4, 0], sizes = [1, 128], strides = [1, 1]} : vector<8x128xf32> to vector<1x128xf32>
    %c1_45 = arith.constant 1 : index
    %c512_46 = arith.constant 512 : index
    %63 = vector.load %arg12[%c1_45, %c512_46] : memref<4x1024xf32, #tpu.memory_space<vmem>>, vector<1x128xf32>
    tpu.vector_store %arg12[%c1_45, %c512_46], %62 {strides = array<i32>} : memref<4x1024xf32, #tpu.memory_space<vmem>>, vector<1x128xf32>,
    %64 = vector.extract_strided_slice %53 {offsets = [5, 0], sizes = [1, 128], strides = [1, 1]} : vector<8x128xf32> to vector<1x128xf32>
    %c1_47 = arith.constant 1 : index
    %c640_48 = arith.constant 640 : index
    %65 = vector.load %arg12[%c1_47, %c640_48] : memref<4x1024xf32, #tpu.memory_space<vmem>>, vector<1x128xf32>
    tpu.vector_store %arg12[%c1_47, %c640_48], %64 {strides = array<i32>} : memref<4x1024xf32, #tpu.memory_space<vmem>>, vector<1x128xf32>,
    %66 = vector.extract_strided_slice %53 {offsets = [6, 0], sizes = [1, 128], strides = [1, 1]} : vector<8x128xf32> to vector<1x128xf32>
    %c1_49 = arith.constant 1 : index
    %c768_50 = arith.constant 768 : index
    %67 = vector.load %arg12[%c1_49, %c768_50] : memref<4x1024xf32, #tpu.memory_space<vmem>>, vector<1x128xf32>
    tpu.vector_store %arg12[%c1_49, %c768_50], %66 {strides = array<i32>} : memref<4x1024xf32, #tpu.memory_space<vmem>>, vector<1x128xf32>,
    %68 = vector.extract_strided_slice %53 {offsets = [7, 0], sizes = [1, 128], strides = [1, 1]} : vector<8x128xf32> to vector<1x128xf32>
    %c1_51 = arith.constant 1 : index
    %c896_52 = arith.constant 896 : index
    %69 = vector.load %arg12[%c1_51, %c896_52] : memref<4x1024xf32, #tpu.memory_space<vmem>>, vector<1x128xf32>
    tpu.vector_store %arg12[%c1_51, %c896_52], %68 {strides = array<i32>} : memref<4x1024xf32, #tpu.memory_space<vmem>>, vector<1x128xf32>,
    %70 = vector.extract_strided_slice %22 {offsets = [0, 512], sizes = [8, 128], strides = [1, 1]} : vector<8x1024xf32> to vector<8x128xf32>
    %71 = vector.extract_strided_slice %22 {offsets = [0, 640], sizes = [8, 128], strides = [1, 1]} : vector<8x1024xf32> to vector<8x128xf32>
    %72 = arith.maximumf %70, %71 : vector<8x128xf32>
    %73 = vector.broadcast %23 : vector<8x1xf32> to vector<8x128xf32>
    %74 = arith.addf %72, %73 : vector<8x128xf32>
    %cst_53 = arith.constant 0.000000e+00 : f32
    %75 = vector.broadcast %cst_53 : f32 to vector<8x128xf32>
    %76 = arith.maximumf %74, %75 : vector<8x128xf32>
    %77 = vector.extract_strided_slice %76 {offsets = [0, 0], sizes = [1, 128], strides = [1, 1]} : vector<8x128xf32> to vector<1x128xf32>
    %c2 = arith.constant 2 : index
    %c0_54 = arith.constant 0 : index
    %78 = vector.load %arg12[%c2, %c0_54] : memref<4x1024xf32, #tpu.memory_space<vmem>>, vector<1x128xf32>
    tpu.vector_store %arg12[%c2, %c0_54], %77 {strides = array<i32>} : memref<4x1024xf32, #tpu.memory_space<vmem>>, vector<1x128xf32>,
    %79 = vector.extract_strided_slice %76 {offsets = [1, 0], sizes = [1, 128], strides = [1, 1]} : vector<8x128xf32> to vector<1x128xf32>
    %c2_55 = arith.constant 2 : index
    %c128_56 = arith.constant 128 : index
    %80 = vector.load %arg12[%c2_55, %c128_56] : memref<4x1024xf32, #tpu.memory_space<vmem>>, vector<1x128xf32>
    tpu.vector_store %arg12[%c2_55, %c128_56], %79 {strides = array<i32>} : memref<4x1024xf32, #tpu.memory_space<vmem>>, vector<1x128xf32>,
    %81 = vector.extract_strided_slice %76 {offsets = [2, 0], sizes = [1, 128], strides = [1, 1]} : vector<8x128xf32> to vector<1x128xf32>
    %c2_57 = arith.constant 2 : index
    %c256_58 = arith.constant 256 : index
    %82 = vector.load %arg12[%c2_57, %c256_58] : memref<4x1024xf32, #tpu.memory_space<vmem>>, vector<1x128xf32>
    tpu.vector_store %arg12[%c2_57, %c256_58], %81 {strides = array<i32>} : memref<4x1024xf32, #tpu.memory_space<vmem>>, vector<1x128xf32>,
    %83 = vector.extract_strided_slice %76 {offsets = [3, 0], sizes = [1, 128], strides = [1, 1]} : vector<8x128xf32> to vector<1x128xf32>
    %c2_59 = arith.constant 2 : index
    %c384_60 = arith.constant 384 : index
    %84 = vector.load %arg12[%c2_59, %c384_60] : memref<4x1024xf32, #tpu.memory_space<vmem>>, vector<1x128xf32>
    tpu.vector_store %arg12[%c2_59, %c384_60], %83 {strides = array<i32>} : memref<4x1024xf32, #tpu.memory_space<vmem>>, vector<1x128xf32>,
    %85 = vector.extract_strided_slice %76 {offsets = [4, 0], sizes = [1, 128], strides = [1, 1]} : vector<8x128xf32> to vector<1x128xf32>
    %c2_61 = arith.constant 2 : index
    %c512_62 = arith.constant 512 : index
    %86 = vector.load %arg12[%c2_61, %c512_62] : memref<4x1024xf32, #tpu.memory_space<vmem>>, vector<1x128xf32>
    tpu.vector_store %arg12[%c2_61, %c512_62], %85 {strides = array<i32>} : memref<4x1024xf32, #tpu.memory_space<vmem>>, vector<1x128xf32>,
    %87 = vector.extract_strided_slice %76 {offsets = [5, 0], sizes = [1, 128], strides = [1, 1]} : vector<8x128xf32> to vector<1x128xf32>
    %c2_63 = arith.constant 2 : index
    %c640_64 = arith.constant 640 : index
    %88 = vector.load %arg12[%c2_63, %c640_64] : memref<4x1024xf32, #tpu.memory_space<vmem>>, vector<1x128xf32>
    tpu.vector_store %arg12[%c2_63, %c640_64], %87 {strides = array<i32>} : memref<4x1024xf32, #tpu.memory_space<vmem>>, vector<1x128xf32>,
    %89 = vector.extract_strided_slice %76 {offsets = [6, 0], sizes = [1, 128], strides = [1, 1]} : vector<8x128xf32> to vector<1x128xf32>
    %c2_65 = arith.constant 2 : index
    %c768_66 = arith.constant 768 : index
    %90 = vector.load %arg12[%c2_65, %c768_66] : memref<4x1024xf32, #tpu.memory_space<vmem>>, vector<1x128xf32>
    tpu.vector_store %arg12[%c2_65, %c768_66], %89 {strides = array<i32>} : memref<4x1024xf32, #tpu.memory_space<vmem>>, vector<1x128xf32>,
    %91 = vector.extract_strided_slice %76 {offsets = [7, 0], sizes = [1, 128], strides = [1, 1]} : vector<8x128xf32> to vector<1x128xf32>
    %c2_67 = arith.constant 2 : index
    %c896_68 = arith.constant 896 : index
    %92 = vector.load %arg12[%c2_67, %c896_68] : memref<4x1024xf32, #tpu.memory_space<vmem>>, vector<1x128xf32>
    tpu.vector_store %arg12[%c2_67, %c896_68], %91 {strides = array<i32>} : memref<4x1024xf32, #tpu.memory_space<vmem>>, vector<1x128xf32>,
    %93 = vector.extract_strided_slice %22 {offsets = [0, 768], sizes = [8, 128], strides = [1, 1]} : vector<8x1024xf32> to vector<8x128xf32>
    %94 = vector.extract_strided_slice %22 {offsets = [0, 896], sizes = [8, 128], strides = [1, 1]} : vector<8x1024xf32> to vector<8x128xf32>
    %95 = arith.maximumf %93, %94 : vector<8x128xf32>
    %96 = vector.broadcast %23 : vector<8x1xf32> to vector<8x128xf32>
    %97 = arith.addf %95, %96 : vector<8x128xf32>
    %cst_69 = arith.constant 0.000000e+00 : f32
    %98 = vector.broadcast %cst_69 : f32 to vector<8x128xf32>
    %99 = arith.maximumf %97, %98 : vector<8x128xf32>
    %100 = vector.extract_strided_slice %99 {offsets = [0, 0], sizes = [1, 128], strides = [1, 1]} : vector<8x128xf32> to vector<1x128xf32>
    %c3 = arith.constant 3 : index
    %c0_70 = arith.constant 0 : index
    %101 = vector.load %arg12[%c3, %c0_70] : memref<4x1024xf32, #tpu.memory_space<vmem>>, vector<1x128xf32>
    tpu.vector_store %arg12[%c3, %c0_70], %100 {strides = array<i32>} : memref<4x1024xf32, #tpu.memory_space<vmem>>, vector<1x128xf32>,
    %102 = vector.extract_strided_slice %99 {offsets = [1, 0], sizes = [1, 128], strides = [1, 1]} : vector<8x128xf32> to vector<1x128xf32>
    %c3_71 = arith.constant 3 : index
    %c128_72 = arith.constant 128 : index
    %103 = vector.load %arg12[%c3_71, %c128_72] : memref<4x1024xf32, #tpu.memory_space<vmem>>, vector<1x128xf32>
    tpu.vector_store %arg12[%c3_71, %c128_72], %102 {strides = array<i32>} : memref<4x1024xf32, #tpu.memory_space<vmem>>, vector<1x128xf32>,
    %104 = vector.extract_strided_slice %99 {offsets = [2, 0], sizes = [1, 128], strides = [1, 1]} : vector<8x128xf32> to vector<1x128xf32>
    %c3_73 = arith.constant 3 : index
    %c256_74 = arith.constant 256 : index
    %105 = vector.load %arg12[%c3_73, %c256_74] : memref<4x1024xf32, #tpu.memory_space<vmem>>, vector<1x128xf32>
    tpu.vector_store %arg12[%c3_73, %c256_74], %104 {strides = array<i32>} : memref<4x1024xf32, #tpu.memory_space<vmem>>, vector<1x128xf32>,
    %106 = vector.extract_strided_slice %99 {offsets = [3, 0], sizes = [1, 128], strides = [1, 1]} : vector<8x128xf32> to vector<1x128xf32>
    %c3_75 = arith.constant 3 : index
    %c384_76 = arith.constant 384 : index
    %107 = vector.load %arg12[%c3_75, %c384_76] : memref<4x1024xf32, #tpu.memory_space<vmem>>, vector<1x128xf32>
    tpu.vector_store %arg12[%c3_75, %c384_76], %106 {strides = array<i32>} : memref<4x1024xf32, #tpu.memory_space<vmem>>, vector<1x128xf32>,
    %108 = vector.extract_strided_slice %99 {offsets = [4, 0], sizes = [1, 128], strides = [1, 1]} : vector<8x128xf32> to vector<1x128xf32>
    %c3_77 = arith.constant 3 : index
    %c512_78 = arith.constant 512 : index
    %109 = vector.load %arg12[%c3_77, %c512_78] : memref<4x1024xf32, #tpu.memory_space<vmem>>, vector<1x128xf32>
    tpu.vector_store %arg12[%c3_77, %c512_78], %108 {strides = array<i32>} : memref<4x1024xf32, #tpu.memory_space<vmem>>, vector<1x128xf32>,
    %110 = vector.extract_strided_slice %99 {offsets = [5, 0], sizes = [1, 128], strides = [1, 1]} : vector<8x128xf32> to vector<1x128xf32>
    %c3_79 = arith.constant 3 : index
    %c640_80 = arith.constant 640 : index
    %111 = vector.load %arg12[%c3_79, %c640_80] : memref<4x1024xf32, #tpu.memory_space<vmem>>, vector<1x128xf32>
    tpu.vector_store %arg12[%c3_79, %c640_80], %110 {strides = array<i32>} : memref<4x1024xf32, #tpu.memory_space<vmem>>, vector<1x128xf32>,
    %112 = vector.extract_strided_slice %99 {offsets = [6, 0], sizes = [1, 128], strides = [1, 1]} : vector<8x128xf32> to vector<1x128xf32>
    %c3_81 = arith.constant 3 : index
    %c768_82 = arith.constant 768 : index
    %113 = vector.load %arg12[%c3_81, %c768_82] : memref<4x1024xf32, #tpu.memory_space<vmem>>, vector<1x128xf32>
    tpu.vector_store %arg12[%c3_81, %c768_82], %112 {strides = array<i32>} : memref<4x1024xf32, #tpu.memory_space<vmem>>, vector<1x128xf32>,
    %114 = vector.extract_strided_slice %99 {offsets = [7, 0], sizes = [1, 128], strides = [1, 1]} : vector<8x128xf32> to vector<1x128xf32>
    %c3_83 = arith.constant 3 : index
    %c896_84 = arith.constant 896 : index
    %115 = vector.load %arg12[%c3_83, %c896_84] : memref<4x1024xf32, #tpu.memory_space<vmem>>, vector<1x128xf32>
    tpu.vector_store %arg12[%c3_83, %c896_84], %114 {strides = array<i32>} : memref<4x1024xf32, #tpu.memory_space<vmem>>, vector<1x128xf32>,
    %c0_85 = arith.constant 0 : index
    %c0_86 = arith.constant 0 : index
    %116 = vector.load %arg12[%c0_85, %c0_86] : memref<4x1024xf32, #tpu.memory_space<vmem>>, vector<4x1024xf32>
    %c0_87 = arith.constant 0 : index
    %c0_88 = arith.constant 0 : index
    %117 = vector.load %arg4[%c0_87, %c0_88] : memref<1024x80xf32, #tpu.memory_space<vmem>>, vector<1024x80xf32>
    %cst_89 = arith.constant dense<0.000000e+00> : vector<4x80xf32>
    %118 = tpu.matmul %116, %117, %cst_89 {dimension_numbers = #tpu.dot_dimension_numbers<[1], [0], [0], [1], [0, 0, 1, 1], [], []>} : vector<4x1024xf32>, vector<1024x80xf32>, vector<4x80xf32> -> vector<4x80xf32>
    %c0_90 = arith.constant 0 : index
    %c0_91 = arith.constant 0 : index
    %119 = vector.load %arg5[%c0_90, %c0_91] : memref<1x80xf32, #tpu.memory_space<vmem>>, vector<1x80xf32>
    %120 = vector.broadcast %119 : vector<1x80xf32> to vector<4x80xf32>
    %121 = arith.addf %118, %120 : vector<4x80xf32>
    %cst_92 = arith.constant 0.000000e+00 : f32
    %122 = vector.broadcast %cst_92 : f32 to vector<4x80xf32>
    %123 = arith.maximumf %121, %122 : vector<4x80xf32>
    %c0_93 = arith.constant 0 : index
    %c0_94 = arith.constant 0 : index
    %124 = vector.load %arg6[%c0_93, %c0_94] : memref<80x1024xf32, #tpu.memory_space<vmem>>, vector<80x1024xf32>
    %cst_95 = arith.constant dense<0.000000e+00> : vector<4x1024xf32>
    %125 = tpu.matmul %123, %124, %cst_95 {dimension_numbers = #tpu.dot_dimension_numbers<[1], [0], [0], [1], [0, 0, 1, 1], [], []>} : vector<4x80xf32>, vector<80x1024xf32>, vector<4x1024xf32> -> vector<4x1024xf32>
    %c0_96 = arith.constant 0 : index
    %c0_97 = arith.constant 0 : index
    %126 = vector.load %arg7[%c0_96, %c0_97] : memref<1x1024xf32, #tpu.memory_space<vmem>>, vector<1x1024xf32>
    %127 = vector.broadcast %126 : vector<1x1024xf32> to vector<4x1024xf32>
    %128 = arith.addf %125, %127 : vector<4x1024xf32>
    %cst_98 = arith.constant 0.000000e+00 : f32
    %129 = vector.broadcast %cst_98 : f32 to vector<4x1024xf32>
    %130 = arith.maximumf %128, %129 : vector<4x1024xf32>
    %131 = vector.extract_strided_slice %130 {offsets = [0, 0], sizes = [1, 128], strides = [1, 1]} : vector<4x1024xf32> to vector<1x128xf32>
    %c0_99 = arith.constant 0 : index
    %c0_100 = arith.constant 0 : index
    %132 = vector.load %arg13[%c0_99, %c0_100] : memref<16x256xf32, #tpu.memory_space<vmem>>, vector<1x128xf32>
    tpu.vector_store %arg13[%c0_99, %c0_100], %131 {strides = array<i32>} : memref<16x256xf32, #tpu.memory_space<vmem>>, vector<1x128xf32>,
    %133 = vector.extract_strided_slice %130 {offsets = [1, 0], sizes = [1, 128], strides = [1, 1]} : vector<4x1024xf32> to vector<1x128xf32>
    %c1_101 = arith.constant 1 : index
    %c0_102 = arith.constant 0 : index
    %134 = vector.load %arg13[%c1_101, %c0_102] : memref<16x256xf32, #tpu.memory_space<vmem>>, vector<1x128xf32>
    tpu.vector_store %arg13[%c1_101, %c0_102], %133 {strides = array<i32>} : memref<16x256xf32, #tpu.memory_space<vmem>>, vector<1x128xf32>,
    %135 = vector.extract_strided_slice %130 {offsets = [0, 128], sizes = [1, 128], strides = [1, 1]} : vector<4x1024xf32> to vector<1x128xf32>
    %c2_103 = arith.constant 2 : index
    %c0_104 = arith.constant 0 : index
    %136 = vector.load %arg13[%c2_103, %c0_104] : memref<16x256xf32, #tpu.memory_space<vmem>>, vector<1x128xf32>
    tpu.vector_store %arg13[%c2_103, %c0_104], %135 {strides = array<i32>} : memref<16x256xf32, #tpu.memory_space<vmem>>, vector<1x128xf32>,
    %137 = vector.extract_strided_slice %130 {offsets = [1, 128], sizes = [1, 128], strides = [1, 1]} : vector<4x1024xf32> to vector<1x128xf32>
    %c3_105 = arith.constant 3 : index
    %c0_106 = arith.constant 0 : index
    %138 = vector.load %arg13[%c3_105, %c0_106] : memref<16x256xf32, #tpu.memory_space<vmem>>, vector<1x128xf32>
    tpu.vector_store %arg13[%c3_105, %c0_106], %137 {strides = array<i32>} : memref<16x256xf32, #tpu.memory_space<vmem>>, vector<1x128xf32>,
    %139 = vector.extract_strided_slice %130 {offsets = [0, 256], sizes = [1, 128], strides = [1, 1]} : vector<4x1024xf32> to vector<1x128xf32>
    %c4 = arith.constant 4 : index
    %c0_107 = arith.constant 0 : index
    %140 = vector.load %arg13[%c4, %c0_107] : memref<16x256xf32, #tpu.memory_space<vmem>>, vector<1x128xf32>
    tpu.vector_store %arg13[%c4, %c0_107], %139 {strides = array<i32>} : memref<16x256xf32, #tpu.memory_space<vmem>>, vector<1x128xf32>,
    %141 = vector.extract_strided_slice %130 {offsets = [1, 256], sizes = [1, 128], strides = [1, 1]} : vector<4x1024xf32> to vector<1x128xf32>
    %c5 = arith.constant 5 : index
    %c0_108 = arith.constant 0 : index
    %142 = vector.load %arg13[%c5, %c0_108] : memref<16x256xf32, #tpu.memory_space<vmem>>, vector<1x128xf32>
    tpu.vector_store %arg13[%c5, %c0_108], %141 {strides = array<i32>} : memref<16x256xf32, #tpu.memory_space<vmem>>, vector<1x128xf32>,
    %143 = vector.extract_strided_slice %130 {offsets = [0, 384], sizes = [1, 128], strides = [1, 1]} : vector<4x1024xf32> to vector<1x128xf32>
    %c6 = arith.constant 6 : index
    %c0_109 = arith.constant 0 : index
    %144 = vector.load %arg13[%c6, %c0_109] : memref<16x256xf32, #tpu.memory_space<vmem>>, vector<1x128xf32>
    tpu.vector_store %arg13[%c6, %c0_109], %143 {strides = array<i32>} : memref<16x256xf32, #tpu.memory_space<vmem>>, vector<1x128xf32>,
    %145 = vector.extract_strided_slice %130 {offsets = [1, 384], sizes = [1, 128], strides = [1, 1]} : vector<4x1024xf32> to vector<1x128xf32>
    %c7 = arith.constant 7 : index
    %c0_110 = arith.constant 0 : index
    %146 = vector.load %arg13[%c7, %c0_110] : memref<16x256xf32, #tpu.memory_space<vmem>>, vector<1x128xf32>
    tpu.vector_store %arg13[%c7, %c0_110], %145 {strides = array<i32>} : memref<16x256xf32, #tpu.memory_space<vmem>>, vector<1x128xf32>,
    %147 = vector.extract_strided_slice %130 {offsets = [0, 512], sizes = [1, 128], strides = [1, 1]} : vector<4x1024xf32> to vector<1x128xf32>
    %c8 = arith.constant 8 : index
    %c0_111 = arith.constant 0 : index
    %148 = vector.load %arg13[%c8, %c0_111] : memref<16x256xf32, #tpu.memory_space<vmem>>, vector<1x128xf32>
    tpu.vector_store %arg13[%c8, %c0_111], %147 {strides = array<i32>} : memref<16x256xf32, #tpu.memory_space<vmem>>, vector<1x128xf32>,
    %149 = vector.extract_strided_slice %130 {offsets = [1, 512], sizes = [1, 128], strides = [1, 1]} : vector<4x1024xf32> to vector<1x128xf32>
    %c9 = arith.constant 9 : index
    %c0_112 = arith.constant 0 : index
    %150 = vector.load %arg13[%c9, %c0_112] : memref<16x256xf32, #tpu.memory_space<vmem>>, vector<1x128xf32>
    tpu.vector_store %arg13[%c9, %c0_112], %149 {strides = array<i32>} : memref<16x256xf32, #tpu.memory_space<vmem>>, vector<1x128xf32>,
    %151 = vector.extract_strided_slice %130 {offsets = [0, 640], sizes = [1, 128], strides = [1, 1]} : vector<4x1024xf32> to vector<1x128xf32>
    %c10 = arith.constant 10 : index
    %c0_113 = arith.constant 0 : index
    %152 = vector.load %arg13[%c10, %c0_113] : memref<16x256xf32, #tpu.memory_space<vmem>>, vector<1x128xf32>
    tpu.vector_store %arg13[%c10, %c0_113], %151 {strides = array<i32>} : memref<16x256xf32, #tpu.memory_space<vmem>>, vector<1x128xf32>,
    %153 = vector.extract_strided_slice %130 {offsets = [1, 640], sizes = [1, 128], strides = [1, 1]} : vector<4x1024xf32> to vector<1x128xf32>
    %c11 = arith.constant 11 : index
    %c0_114 = arith.constant 0 : index
    %154 = vector.load %arg13[%c11, %c0_114] : memref<16x256xf32, #tpu.memory_space<vmem>>, vector<1x128xf32>
    tpu.vector_store %arg13[%c11, %c0_114], %153 {strides = array<i32>} : memref<16x256xf32, #tpu.memory_space<vmem>>, vector<1x128xf32>,
    %155 = vector.extract_strided_slice %130 {offsets = [0, 768], sizes = [1, 128], strides = [1, 1]} : vector<4x1024xf32> to vector<1x128xf32>
    %c12 = arith.constant 12 : index
    %c0_115 = arith.constant 0 : index
    %156 = vector.load %arg13[%c12, %c0_115] : memref<16x256xf32, #tpu.memory_space<vmem>>, vector<1x128xf32>
    tpu.vector_store %arg13[%c12, %c0_115], %155 {strides = array<i32>} : memref<16x256xf32, #tpu.memory_space<vmem>>, vector<1x128xf32>,
    %157 = vector.extract_strided_slice %130 {offsets = [1, 768], sizes = [1, 128], strides = [1, 1]} : vector<4x1024xf32> to vector<1x128xf32>
    %c13 = arith.constant 13 : index
    %c0_116 = arith.constant 0 : index
    %158 = vector.load %arg13[%c13, %c0_116] : memref<16x256xf32, #tpu.memory_space<vmem>>, vector<1x128xf32>
    tpu.vector_store %arg13[%c13, %c0_116], %157 {strides = array<i32>} : memref<16x256xf32, #tpu.memory_space<vmem>>, vector<1x128xf32>,
    %159 = vector.extract_strided_slice %130 {offsets = [0, 896], sizes = [1, 128], strides = [1, 1]} : vector<4x1024xf32> to vector<1x128xf32>
    %c14 = arith.constant 14 : index
    %c0_117 = arith.constant 0 : index
    %160 = vector.load %arg13[%c14, %c0_117] : memref<16x256xf32, #tpu.memory_space<vmem>>, vector<1x128xf32>
    tpu.vector_store %arg13[%c14, %c0_117], %159 {strides = array<i32>} : memref<16x256xf32, #tpu.memory_space<vmem>>, vector<1x128xf32>,
    %161 = vector.extract_strided_slice %130 {offsets = [1, 896], sizes = [1, 128], strides = [1, 1]} : vector<4x1024xf32> to vector<1x128xf32>
    %c15 = arith.constant 15 : index
    %c0_118 = arith.constant 0 : index
    %162 = vector.load %arg13[%c15, %c0_118] : memref<16x256xf32, #tpu.memory_space<vmem>>, vector<1x128xf32>
    tpu.vector_store %arg13[%c15, %c0_118], %161 {strides = array<i32>} : memref<16x256xf32, #tpu.memory_space<vmem>>, vector<1x128xf32>,
    %163 = vector.extract_strided_slice %130 {offsets = [2, 0], sizes = [1, 128], strides = [1, 1]} : vector<4x1024xf32> to vector<1x128xf32>
    %c0_119 = arith.constant 0 : index
    %c128_120 = arith.constant 128 : index
    %164 = vector.load %arg13[%c0_119, %c128_120] : memref<16x256xf32, #tpu.memory_space<vmem>>, vector<1x128xf32>
    tpu.vector_store %arg13[%c0_119, %c128_120], %163 {strides = array<i32>} : memref<16x256xf32, #tpu.memory_space<vmem>>, vector<1x128xf32>,
    %165 = vector.extract_strided_slice %130 {offsets = [3, 0], sizes = [1, 128], strides = [1, 1]} : vector<4x1024xf32> to vector<1x128xf32>
    %c1_121 = arith.constant 1 : index
    %c128_122 = arith.constant 128 : index
    %166 = vector.load %arg13[%c1_121, %c128_122] : memref<16x256xf32, #tpu.memory_space<vmem>>, vector<1x128xf32>
    tpu.vector_store %arg13[%c1_121, %c128_122], %165 {strides = array<i32>} : memref<16x256xf32, #tpu.memory_space<vmem>>, vector<1x128xf32>,
    %167 = vector.extract_strided_slice %130 {offsets = [2, 128], sizes = [1, 128], strides = [1, 1]} : vector<4x1024xf32> to vector<1x128xf32>
    %c2_123 = arith.constant 2 : index
    %c128_124 = arith.constant 128 : index
    %168 = vector.load %arg13[%c2_123, %c128_124] : memref<16x256xf32, #tpu.memory_space<vmem>>, vector<1x128xf32>
    tpu.vector_store %arg13[%c2_123, %c128_124], %167 {strides = array<i32>} : memref<16x256xf32, #tpu.memory_space<vmem>>, vector<1x128xf32>,
    %169 = vector.extract_strided_slice %130 {offsets = [3, 128], sizes = [1, 128], strides = [1, 1]} : vector<4x1024xf32> to vector<1x128xf32>
    %c3_125 = arith.constant 3 : index
    %c128_126 = arith.constant 128 : index
    %170 = vector.load %arg13[%c3_125, %c128_126] : memref<16x256xf32, #tpu.memory_space<vmem>>, vector<1x128xf32>
    tpu.vector_store %arg13[%c3_125, %c128_126], %169 {strides = array<i32>} : memref<16x256xf32, #tpu.memory_space<vmem>>, vector<1x128xf32>,
    %171 = vector.extract_strided_slice %130 {offsets = [2, 256], sizes = [1, 128], strides = [1, 1]} : vector<4x1024xf32> to vector<1x128xf32>
    %c4_127 = arith.constant 4 : index
    %c128_128 = arith.constant 128 : index
    %172 = vector.load %arg13[%c4_127, %c128_128] : memref<16x256xf32, #tpu.memory_space<vmem>>, vector<1x128xf32>
    tpu.vector_store %arg13[%c4_127, %c128_128], %171 {strides = array<i32>} : memref<16x256xf32, #tpu.memory_space<vmem>>, vector<1x128xf32>,
    %173 = vector.extract_strided_slice %130 {offsets = [3, 256], sizes = [1, 128], strides = [1, 1]} : vector<4x1024xf32> to vector<1x128xf32>
    %c5_129 = arith.constant 5 : index
    %c128_130 = arith.constant 128 : index
    %174 = vector.load %arg13[%c5_129, %c128_130] : memref<16x256xf32, #tpu.memory_space<vmem>>, vector<1x128xf32>
    tpu.vector_store %arg13[%c5_129, %c128_130], %173 {strides = array<i32>} : memref<16x256xf32, #tpu.memory_space<vmem>>, vector<1x128xf32>,
    %175 = vector.extract_strided_slice %130 {offsets = [2, 384], sizes = [1, 128], strides = [1, 1]} : vector<4x1024xf32> to vector<1x128xf32>
    %c6_131 = arith.constant 6 : index
    %c128_132 = arith.constant 128 : index
    %176 = vector.load %arg13[%c6_131, %c128_132] : memref<16x256xf32, #tpu.memory_space<vmem>>, vector<1x128xf32>
    tpu.vector_store %arg13[%c6_131, %c128_132], %175 {strides = array<i32>} : memref<16x256xf32, #tpu.memory_space<vmem>>, vector<1x128xf32>,
    %177 = vector.extract_strided_slice %130 {offsets = [3, 384], sizes = [1, 128], strides = [1, 1]} : vector<4x1024xf32> to vector<1x128xf32>
    %c7_133 = arith.constant 7 : index
    %c128_134 = arith.constant 128 : index
    %178 = vector.load %arg13[%c7_133, %c128_134] : memref<16x256xf32, #tpu.memory_space<vmem>>, vector<1x128xf32>
    tpu.vector_store %arg13[%c7_133, %c128_134], %177 {strides = array<i32>} : memref<16x256xf32, #tpu.memory_space<vmem>>, vector<1x128xf32>,
    %179 = vector.extract_strided_slice %130 {offsets = [2, 512], sizes = [1, 128], strides = [1, 1]} : vector<4x1024xf32> to vector<1x128xf32>
    %c8_135 = arith.constant 8 : index
    %c128_136 = arith.constant 128 : index
    %180 = vector.load %arg13[%c8_135, %c128_136] : memref<16x256xf32, #tpu.memory_space<vmem>>, vector<1x128xf32>
    tpu.vector_store %arg13[%c8_135, %c128_136], %179 {strides = array<i32>} : memref<16x256xf32, #tpu.memory_space<vmem>>, vector<1x128xf32>,
    %181 = vector.extract_strided_slice %130 {offsets = [3, 512], sizes = [1, 128], strides = [1, 1]} : vector<4x1024xf32> to vector<1x128xf32>
    %c9_137 = arith.constant 9 : index
    %c128_138 = arith.constant 128 : index
    %182 = vector.load %arg13[%c9_137, %c128_138] : memref<16x256xf32, #tpu.memory_space<vmem>>, vector<1x128xf32>
    tpu.vector_store %arg13[%c9_137, %c128_138], %181 {strides = array<i32>} : memref<16x256xf32, #tpu.memory_space<vmem>>, vector<1x128xf32>,
    %183 = vector.extract_strided_slice %130 {offsets = [2, 640], sizes = [1, 128], strides = [1, 1]} : vector<4x1024xf32> to vector<1x128xf32>
    %c10_139 = arith.constant 10 : index
    %c128_140 = arith.constant 128 : index
    %184 = vector.load %arg13[%c10_139, %c128_140] : memref<16x256xf32, #tpu.memory_space<vmem>>, vector<1x128xf32>
    tpu.vector_store %arg13[%c10_139, %c128_140], %183 {strides = array<i32>} : memref<16x256xf32, #tpu.memory_space<vmem>>, vector<1x128xf32>,
    %185 = vector.extract_strided_slice %130 {offsets = [3, 640], sizes = [1, 128], strides = [1, 1]} : vector<4x1024xf32> to vector<1x128xf32>
    %c11_141 = arith.constant 11 : index
    %c128_142 = arith.constant 128 : index
    %186 = vector.load %arg13[%c11_141, %c128_142] : memref<16x256xf32, #tpu.memory_space<vmem>>, vector<1x128xf32>
    tpu.vector_store %arg13[%c11_141, %c128_142], %185 {strides = array<i32>} : memref<16x256xf32, #tpu.memory_space<vmem>>, vector<1x128xf32>,
    %187 = vector.extract_strided_slice %130 {offsets = [2, 768], sizes = [1, 128], strides = [1, 1]} : vector<4x1024xf32> to vector<1x128xf32>
    %c12_143 = arith.constant 12 : index
    %c128_144 = arith.constant 128 : index
    %188 = vector.load %arg13[%c12_143, %c128_144] : memref<16x256xf32, #tpu.memory_space<vmem>>, vector<1x128xf32>
    tpu.vector_store %arg13[%c12_143, %c128_144], %187 {strides = array<i32>} : memref<16x256xf32, #tpu.memory_space<vmem>>, vector<1x128xf32>,
    %189 = vector.extract_strided_slice %130 {offsets = [3, 768], sizes = [1, 128], strides = [1, 1]} : vector<4x1024xf32> to vector<1x128xf32>
    %c13_145 = arith.constant 13 : index
    %c128_146 = arith.constant 128 : index
    %190 = vector.load %arg13[%c13_145, %c128_146] : memref<16x256xf32, #tpu.memory_space<vmem>>, vector<1x128xf32>
    tpu.vector_store %arg13[%c13_145, %c128_146], %189 {strides = array<i32>} : memref<16x256xf32, #tpu.memory_space<vmem>>, vector<1x128xf32>,
    %191 = vector.extract_strided_slice %130 {offsets = [2, 896], sizes = [1, 128], strides = [1, 1]} : vector<4x1024xf32> to vector<1x128xf32>
    %c14_147 = arith.constant 14 : index
    %c128_148 = arith.constant 128 : index
    %192 = vector.load %arg13[%c14_147, %c128_148] : memref<16x256xf32, #tpu.memory_space<vmem>>, vector<1x128xf32>
    tpu.vector_store %arg13[%c14_147, %c128_148], %191 {strides = array<i32>} : memref<16x256xf32, #tpu.memory_space<vmem>>, vector<1x128xf32>,
    %193 = vector.extract_strided_slice %130 {offsets = [3, 896], sizes = [1, 128], strides = [1, 1]} : vector<4x1024xf32> to vector<1x128xf32>
    %c15_149 = arith.constant 15 : index
    %c128_150 = arith.constant 128 : index
    %194 = vector.load %arg13[%c15_149, %c128_150] : memref<16x256xf32, #tpu.memory_space<vmem>>, vector<1x128xf32>
    tpu.vector_store %arg13[%c15_149, %c128_150], %193 {strides = array<i32>} : memref<16x256xf32, #tpu.memory_space<vmem>>, vector<1x128xf32>,
    %c0_151 = arith.constant 0 : index
    %c0_152 = arith.constant 0 : index
    %195 = vector.load %arg8[%c0_151, %c0_152] : memref<128x16xf32, #tpu.memory_space<vmem>>, vector<128x16xf32>
    %c0_153 = arith.constant 0 : index
    %c0_154 = arith.constant 0 : index
    %196 = vector.load %arg13[%c0_153, %c0_154] : memref<16x256xf32, #tpu.memory_space<vmem>>, vector<16x256xf32>
    %cst_155 = arith.constant dense<0.000000e+00> : vector<128x256xf32>
    %197 = tpu.matmul %195, %196, %cst_155 {dimension_numbers = #tpu.dot_dimension_numbers<[1], [0], [0], [1], [0, 0, 1, 1], [], []>} : vector<128x16xf32>, vector<16x256xf32>, vector<128x256xf32> -> vector<128x256xf32>
    %c0_156 = arith.constant 0 : index
    %c0_157 = arith.constant 0 : index
    %198 = vector.load %arg9[%c0_156, %c0_157] : memref<128x1xf32, #tpu.memory_space<vmem>>, vector<128x1xf32>
    %199 = vector.broadcast %198 : vector<128x1xf32> to vector<128x256xf32>
    %200 = arith.addf %197, %199 : vector<128x256xf32>
    %cst_158 = arith.constant 0.000000e+00 : f32
    %201 = vector.broadcast %cst_158 : f32 to vector<128x256xf32>
    %202 = arith.maximumf %200, %201 : vector<128x256xf32>
    %203 = vector.extract_strided_slice %202 {offsets = [0, 0], sizes = [128, 128], strides = [1, 1]} : vector<128x256xf32> to vector<128x128xf32>
    %c0_159 = arith.constant 0 : index
    %c0_160 = arith.constant 0 : index
    %c0_161 = arith.constant 0 : index
    %204 = vector.load %arg10[%c0_159, %c0_160, %c0_161] : memref<2x128x128xf32, #tpu.memory_space<vmem>>, vector<1x128x128xf32>
    %205 = vector.shape_cast %204 : vector<1x128x128xf32> to vector<128x128xf32>
    %206 = vector.shape_cast %203 : vector<128x128xf32> to vector<1x128x128xf32>
    tpu.vector_store %arg10[%c0_159, %c0_160, %c0_161], %206 {strides = array<i32>} : memref<2x128x128xf32, #tpu.memory_space<vmem>>, vector<1x128x128xf32>,
    %207 = vector.extract_strided_slice %202 {offsets = [0, 128], sizes = [128, 128], strides = [1, 1]} : vector<128x256xf32> to vector<128x128xf32>
    %c1_162 = arith.constant 1 : index
    %c0_163 = arith.constant 0 : index
    %c0_164 = arith.constant 0 : index
    %208 = vector.load %arg10[%c1_162, %c0_163, %c0_164] : memref<2x128x128xf32, #tpu.memory_space<vmem>>, vector<1x128x128xf32>
    %209 = vector.shape_cast %208 : vector<1x128x128xf32> to vector<128x128xf32>
    %210 = vector.shape_cast %207 : vector<128x128xf32> to vector<1x128x128xf32>
    tpu.vector_store %arg10[%c1_162, %c0_163, %c0_164], %210 {strides = array<i32>} : memref<2x128x128xf32, #tpu.memory_space<vmem>>, vector<1x128x128xf32>,
    return
  }
  func.func @transform_0(%arg0: i32) -> (i32, i32, i32) {
    %c0_i32 = arith.constant 0 : i32
    %c0_i32_0 = arith.constant 0 : i32
    %c0_i32_1 = arith.constant 0 : i32
    %c0_i32_2 = arith.constant 0 : i32
    return %c0_i32, %c0_i32_0, %c0_i32_1 : i32, i32, i32
  }
  func.func @transform_1(%arg0: i32) -> (i32, i32) {
    %c0_i32 = arith.constant 0 : i32
    %c0_i32_0 = arith.constant 0 : i32
    %c0_i32_1 = arith.constant 0 : i32
    return %c0_i32, %c0_i32_0 : i32, i32
  }
  func.func @transform_2(%arg0: i32) -> (i32, i32) {
    %c0_i32 = arith.constant 0 : i32
    %c0_i32_0 = arith.constant 0 : i32
    %c0_i32_1 = arith.constant 0 : i32
    return %c0_i32, %c0_i32_0 : i32, i32
  }
  func.func @transform_3(%arg0: i32) -> (i32, i32) {
    %c0_i32 = arith.constant 0 : i32
    %c0_i32_0 = arith.constant 0 : i32
    %c0_i32_1 = arith.constant 0 : i32
    return %c0_i32, %c0_i32_0 : i32, i32
  }
  func.func @transform_4(%arg0: i32) -> (i32, i32) {
    %c0_i32 = arith.constant 0 : i32
    %c0_i32_0 = arith.constant 0 : i32
    %c0_i32_1 = arith.constant 0 : i32
    return %c0_i32, %c0_i32_0 : i32, i32
  }
  func.func @transform_5(%arg0: i32) -> (i32, i32) {
    %c0_i32 = arith.constant 0 : i32
    %c0_i32_0 = arith.constant 0 : i32
    %c0_i32_1 = arith.constant 0 : i32
    return %c0_i32, %c0_i32_0 : i32, i32
  }
  func.func @transform_6(%arg0: i32) -> (i32, i32) {
    %c0_i32 = arith.constant 0 : i32
    %c0_i32_0 = arith.constant 0 : i32
    %c0_i32_1 = arith.constant 0 : i32
    return %c0_i32, %c0_i32_0 : i32, i32
  }
  func.func @transform_7(%arg0: i32) -> (i32, i32) {
    %c0_i32 = arith.constant 0 : i32
    %c0_i32_0 = arith.constant 0 : i32
    %c0_i32_1 = arith.constant 0 : i32
    return %c0_i32, %c0_i32_0 : i32, i32
  }
  func.func @transform_8(%arg0: i32) -> (i32, i32) {
    %c0_i32 = arith.constant 0 : i32
    %c0_i32_0 = arith.constant 0 : i32
    %c0_i32_1 = arith.constant 0 : i32
    return %c0_i32, %c0_i32_0 : i32, i32
  }
  func.func @transform_9(%arg0: i32) -> (i32, i32, i32) {
    %c0_i32 = arith.constant 0 : i32
    %c0_i32_0 = arith.constant 0 : i32
    %c0_i32_1 = arith.constant 0 : i32
    %c0_i32_2 = arith.constant 0 : i32
    return %c0_i32, %c0_i32_0, %c0_i32_1 : i32, i32, i32
  }
}

</mosaic_0001>

<bundles_post_ra>
// kernel: forward.1
= control target key start
LH: loop header
LB: loop body
LE: loop exit
PB: predicated region body
PF: predicated region fallthrough
CT: control target
= control target key end

     0   :  { %14 = vsyncpa [#allocation6], 0  ;;  %s2254_s0 = inlined_call_operand.vmem [shape: f32[2,128,128], index: 0, kind: input, shape index: {}]   ;;  %s2255_s1 = inlined_call_operand.vmem [shape: f32[8,64], index: 1, kind: input, shape index: {}]   ;;  %s2256_s2 = inlined_call_operand.vmem [shape: f32[8,1], index: 2, kind: input, shape index: {}]   ;;  %s2257_s3 = inlined_call_operand.hbm [shape: f32[1024,80], index: 3, kind: input, shape index: {}]   ;;  %s2258_s4 = inlined_call_operand.vmem [shape: f32[1,80], index: 4, kind: input, shape index: {}]   ;;  %s2259_s5 = inlined_call_operand.hbm [shape: f32[80,1024], index: 5, kind: input, shape index: {}]   ;;  %s2260_s6 = inlined_call_operand.vmem [shape: f32[1,1024], index: 6, kind: input, shape index: {}]   ;;  %s2261_s7 = inlined_call_operand.vmem [shape: f32[128,16], index: 7, kind: input, shape index: {}]   ;;  %s2262_s8 = inlined_call_operand.vmem [shape: f32[128,1], index: 8, kind: input, shape index: {}]   ;;  %s2263_s9 = inlined_call_operand.vmem [shape: f32[2,128,128], index: 9, kind: output, shape index: {}]  }
   0x1   :  { %s26_s11 = sshll.u32 %s2257_s3, 4  ;;  %s27_s11 = int_to_ptr.hbm [resolvable:$true] %s26_s11 }
   0x2   :  { %15 = vsyncpa [#allocation8], 0  ;;  %s1781_s12 = smov [#allocation5]   ;;  %s41_s16 = sshll.u32 %s2259_s5, 4  ;;  %s42_s16 = int_to_ptr.hbm [resolvable:$true] %s41_s16 }
   0x3   :  { %s28_s13 = sshll.u32 %s1781_s12, 4  ;;  %s1782_s17 = smov 128   ;;  %s29_s13 = int_to_ptr.vmem [resolvable:$true] %s28_s13 }
   0x4   :  { %s1783_s18 = smov 8   ;;  %s1784_s19 = smov [#allocation7]  }
   0x5   :  { %34 = dma.hbm_to_vmem [thread:$0]  %s27_s11, 16384, %s29_s13, [#allocation6], %s1782_s17, %s1782_s17, %s1783_s18  }
   0x6   :  { %s43_s20 = sshll.u32 %s1784_s19, 4  ;;  %s1785_s21 = smov 1024   ;;  %s44_s20 = int_to_ptr.vmem [resolvable:$true] %s43_s20 }
   0x7   :  { %s1786_s22 = smov 64  }
   0x8   :  { %49 = dma.hbm_to_vmem [thread:$0]  %s42_s16, 10240, %s44_s20, [#allocation8], %s1785_s21, %s1785_s21, %s1786_s22  }
   0x9   :  { %1777 = dma.done.wait [#allocation6], 16384  }
   0xa   :  { %1778 = vsyncadd [#allocation6], 4294950912 }
   0xb   :  { %1779 = dma.done.wait [#allocation8], 10240  }
   0xc   :  { %1780 = vsyncadd [#allocation8], 4294957056  ;;  %v1787_v0 = vmov 0   ;;  %v386_v1 = vld [vmem:[%s2256_s2] sm:$0xff]  ;;  %v71_v2 = vld [vmem:[%s2254_s0 + $0x38] sm:$0xff]  ;;  %vm222_vm0 = vcmask 523264  }
   0xd   :  { %1725 = vset.pattern.permute.xlu0 %v1787_v0  ;;  %1726 = vset.pattern.permute.xlu1 %v1787_v0  ;;  %v73_v3 = vld [vmem:[%s2254_s0 + $0x48] sm:$0xff]  ;;  %v75_v4 = vld [vmem:[%s2254_s0 + $0x58] sm:$0xff]  ;;  %v70_v6 = vld [vmem:[%s2254_s0 + $0x30] sm:$0xff]  ;;  %vm986_vm1 = vcmask 654336   ;;  %vm1362_vm2 = vcmask 130048  }
   0xe   :  { %1727 = vset.pattern.permute.xlu2 %v1787_v0  ;;  %390 = vperm.xlu0 %1725, %v386_v1   ;;  %v77_v5 = vld [vmem:[%s2254_s0 + $0x68] sm:$0xff]  ;;  %v72_v7 = vld [vmem:[%s2254_s0 + $0x40] sm:$0xff]  ;;  %v74_v8 = vld [vmem:[%s2254_s0 + $0x50] sm:$0xff] }
   0xf   :  { %234 = vmatpush.msra.mxu0 %v71_v2  ;;  %254 = vmatpush.msra.mxu1 %v73_v3  ;;  %v76_v9 = vld [vmem:[%s2254_s0 + $0x60] sm:$0xff]  ;;  %v69_v10 = vld [vmem:[%s2254_s0 + $0x28] sm:$0xff]  ;;  %v67_v13 = vld [vmem:[%s2254_s0 + $0x18] sm:$0xff] }
  0x10   :  { %274 = vmatpush.msra.mxu2 %v75_v4  ;;  %294 = vmatpush.msra.mxu3 %v77_v5  ;;  %v68_v11 = vld [vmem:[%s2254_s0 + $0x20] sm:$0xff]  ;;  %v66_v14 = vld [vmem:[%s2254_s0 + $0x10] sm:$0xff]  ;;  %v65_v15 = vld [vmem:[%s2254_s0 + $0x8] sm:$0xff] }
  0x11   :  { %235 = vmatpush.msra.mxu0 %v70_v6  ;;  %255 = vmatpush.msra.mxu1 %v72_v7  ;;  %v1266_v12 = vld [vmem:[%s2262_s8] sm:$0xff]  ;;  %v1619_v18 = vld [vmem:[%s2254_s0 + $0xb8] sm:$0xff]  ;;  %v1621_v19 = vld [vmem:[%s2254_s0 + $0xc8] sm:$0xff] }
  0x12   :  { %275 = vmatpush.msra.mxu2 %v74_v8  ;;  %295 = vmatpush.msra.mxu3 %v76_v9  ;;  %v64_v16 = vld [vmem:[%s2254_s0] sm:$0xff]  ;;  %v1623_v20 = vld [vmem:[%s2254_s0 + $0xd8] sm:$0xff]  ;;  %v1625_v21 = vld [vmem:[%s2254_s0 + $0xe8] sm:$0xff] }
  0x13   :  { %236 = vmatpush.msra.mxu0 %v69_v10  ;;  %256 = vmatpush.msra.mxu1 %v71_v2  ;;  %v1895_v17 = vld [vmem:[%s2255_s1] sm:$0xff]  ;;  %v1271_v22 = vld [vmem:[%s2262_s8 + $0x28] sm:$0xff]  ;;  %v1618_v23 = vld [vmem:[%s2254_s0 + $0xb0] sm:$0xff] }
  0x14   :  { %276 = vmatpush.msra.mxu2 %v73_v3  ;;  %296 = vmatpush.msra.mxu3 %v75_v4  ;;  %v1620_v24 = vld [vmem:[%s2254_s0 + $0xc0] sm:$0xff]  ;;  %v1622_v25 = vld [vmem:[%s2254_s0 + $0xd0] sm:$0xff]  ;;  %v1617_v27 = vld [vmem:[%s2254_s0 + $0xa8] sm:$0xff] }
  0x15   :  { %237 = vmatpush.msra.mxu0 %v68_v11  ;;  %257 = vmatpush.msra.mxu1 %v70_v6  ;;  %v1624_v26 = vld [vmem:[%s2254_s0 + $0xe0] sm:$0xff]  ;;  %v1615_v29 = vld [vmem:[%s2254_s0 + $0x98] sm:$0xff]  ;;  %v1614_v31 = vld [vmem:[%s2254_s0 + $0x90] sm:$0xff] }
  0x16   :  { %277 = vmatpush.msra.mxu2 %v72_v7  ;;  %297 = vmatpush.msra.mxu3 %v74_v8  ;;  %v1616_v28 = vld [vmem:[%s2254_s0 + $0xa0] sm:$0xff]  ;;  %v1613_v32 = vld [vmem:[%s2254_s0 + $0x88] sm:$0xff]  ;;  %v1277_v34 = vld [vmem:[%s2262_s8 + $0x58] sm:$0xff] }
  0x17   :  { %1284 = vperm.xlu0 %1725, %v1266_v12   ;;  %238 = vmatpush.msra.mxu0 %v67_v13  ;;  %v1274_v30 = vld [vmem:[%s2262_s8 + $0x40] sm:$0xff]  ;;  %v1280_v35 = vld [vmem:[%s2262_s8 + $0x70] sm:$0xff]  ;;  %v614_v38 = vld [vmem:[#allocation5 + $0x170] sm:$0xff] }
  0x18   :  { %258 = vmatpush.msra.mxu1 %v69_v10  ;;  %278 = vmatpush.msra.mxu2 %v71_v2  ;;  %v1612_v33 = vld [vmem:[%s2254_s0 + $0x80] sm:$0xff]  ;;  %v630_v39 = vld [vmem:[#allocation5 + $0x1f0] sm:$0xff]  ;;  %v613_v40 = vld [vmem:[#allocation5 + $0x168] sm:$0xff] }
  0x19   :  { %298 = vmatpush.msra.mxu3 %v73_v3  ;;  %239 = vmatpush.msra.mxu0 %v66_v14  ;;  %v615_v36 = vld [vmem:[#allocation5 + $0x178] sm:$0xff]  ;;  %v629_v41 = vld [vmem:[#allocation5 + $0x1e8] sm:$0xff]  ;;  %v612_v42 = vld [vmem:[#allocation5 + $0x160] sm:$0xff] }
  0x1a   :  { %259 = vmatpush.msra.mxu1 %v68_v11  ;;  %279 = vmatpush.msra.mxu2 %v70_v6  ;;  %v631_v37 = vld [vmem:[#allocation5 + $0x1f8] sm:$0xff]  ;;  %v628_v43 = vld [vmem:[#allocation5 + $0x1e0] sm:$0xff]  ;;  %v610_v46 = vld [vmem:[#allocation5 + $0x150] sm:$0xff] }
  0x1b   :  { %299 = vmatpush.msra.mxu3 %v72_v7  ;;  %240 = vmatpush.msra.mxu0 %v65_v15  ;;  %v611_v44 = vld [vmem:[#allocation5 + $0x158] sm:$0xff]  ;;  %v626_v47 = vld [vmem:[#allocation5 + $0x1d0] sm:$0xff]  ;;  %v609_v51 = vld [vmem:[#allocation5 + $0x148] sm:$0xff] }
  0x1c   :  { %260 = vmatpush.msra.mxu1 %v67_v13  ;;  %280 = vmatpush.msra.mxu2 %v69_v10  ;;  %v627_v45 = vld [vmem:[#allocation5 + $0x1d8] sm:$0xff]  ;;  %v625_v52 = vld [vmem:[#allocation5 + $0x1c8] sm:$0xff]  ;;  %v608_v55 = vld [vmem:[#allocation5 + $0x140] sm:$0xff] }
  0x1d   :  { %300 = vmatpush.msra.mxu3 %v71_v2  ;;  %241 = vmatpush.msra.mxu0 %v64_v16  ;;  %v624_v56 = vld [vmem:[#allocation5 + $0x1c0] sm:$0xff]  ;;  %v607_v58 = vld [vmem:[#allocation5 + $0x138] sm:$0xff]  ;;  %v606_v1 = vld [vmem:[#allocation5 + $0x130] sm:$0xff] }
  0x1e   :  { %261 = vmatpush.msra.mxu1 %v66_v14  ;;  %281 = vmatpush.msra.mxu2 %v68_v11  ;;  %v623_v59 = vld [vmem:[#allocation5 + $0x1b8] sm:$0xff]  ;;  %v622_v3 = vld [vmem:[#allocation5 + $0x1b0] sm:$0xff]  ;;  %v605_v4 = vld [vmem:[#allocation5 + $0x128] sm:$0xff] }
  0x1f   :  { %301 = vmatpush.msra.mxu3 %v70_v6  ;;  %1626 = vmatmul.msk.f32.vlgmr.msra.gmra.mxu0 %vm222_vm0, %v1895_v17  ;;  %v621_v5 = vld [vmem:[#allocation5 + $0x1a8] sm:$0xff]  ;;  %v604_v7 = vld [vmem:[#allocation5 + $0x120] sm:$0xff]  ;;  %v603_v10 = vld [vmem:[#allocation5 + $0x118] sm:$0xff] }
  0x20   :  { %1627 = vmatmul.msk.f32.vlgmr.msra.gmra.mxu1 %vm222_vm0, %v1895_v17  ;;  %1628 = vmatmul.msk.f32.vlgmr.msra.gmra.mxu2 %vm222_vm0, %v1895_v17  ;;  %v620_v8 = vld [vmem:[#allocation5 + $0x1a0] sm:$0xff]  ;;  %v619_v11 = vld [vmem:[#allocation5 + $0x198] sm:$0xff]  ;;  %v602_v15 = vld [vmem:[#allocation5 + $0x110] sm:$0xff] }
  0x21   :  { %1629 = vmatmul.msk.f32.vlgmr.msra.gmra.mxu3 %vm222_vm0, %v1895_v17  ;;  %314 = vmatpush.msrb.mxu0 %v1619_v18  ;;  %v618_v16 = vld [vmem:[#allocation5 + $0x190] sm:$0xff] }
  0x22   :  { %334 = vmatpush.msrb.mxu1 %v1621_v19  ;;  %354 = vmatpush.msrb.mxu2 %v1623_v20 }
  0x23   :  { %374 = vmatpush.msrb.mxu3 %v1625_v21  ;;  %1309 = vperm.xlu0 %1725, %v1271_v22   ;;  %v600_v22 = vld [vmem:[#allocation5 + $0x100] sm:$0xff] }
  0x24   :  { %315 = vmatpush.msrb.mxu0 %v1618_v23  ;;  %335 = vmatpush.msrb.mxu1 %v1620_v24 }
  0x25   :  { %355 = vmatpush.msrb.mxu2 %v1622_v25  ;;  %375 = vmatpush.msrb.mxu3 %v1624_v26 }
  0x26   :  { %316 = vmatpush.msrb.mxu0 %v1617_v27  ;;  %336 = vmatpush.msrb.mxu1 %v1619_v18 }
  0x27   :  { %356 = vmatpush.msrb.mxu2 %v1621_v19  ;;  %376 = vmatpush.msrb.mxu3 %v1623_v20 }
  0x28   :  { %317 = vmatpush.msrb.mxu0 %v1616_v28  ;;  %337 = vmatpush.msrb.mxu1 %v1618_v23 }
  0x29   :  { %357 = vmatpush.msrb.mxu2 %v1620_v24  ;;  %377 = vmatpush.msrb.mxu3 %v1622_v25 }
  0x2a   :  { %318 = vmatpush.msrb.mxu0 %v1615_v29  ;;  %338 = vmatpush.msrb.mxu1 %v1617_v27 }
  0x2b   :  { %358 = vmatpush.msrb.mxu2 %v1619_v18  ;;  %378 = vmatpush.msrb.mxu3 %v1621_v19  ;;  %v617_v19 = vld [vmem:[#allocation5 + $0x188] sm:$0xff] }
  0x2c   :  { %1324 = vperm.xlu0 %1725, %v1274_v30   ;;  %319 = vmatpush.msrb.mxu0 %v1614_v31 }
  0x2d   :  { %339 = vmatpush.msrb.mxu1 %v1616_v28  ;;  %359 = vmatpush.msrb.mxu2 %v1618_v23 }
  0x2e   :  { %379 = vmatpush.msrb.mxu3 %v1620_v24  ;;  %320 = vmatpush.msrb.mxu0 %v1613_v32 }
  0x2f   :  { %340 = vmatpush.msrb.mxu1 %v1615_v29  ;;  %360 = vmatpush.msrb.mxu2 %v1617_v27 }
  0x30   :  { %380 = vmatpush.msrb.mxu3 %v1619_v18  ;;  %321 = vmatpush.msrb.mxu0 %v1612_v33  ;;  %v601_v18 = vld [vmem:[#allocation5 + $0x108] sm:$0xff] }
  0x31   :  { %341 = vmatpush.msrb.mxu1 %v1614_v31  ;;  %361 = vmatpush.msrb.mxu2 %v1616_v28 }
  0x32   :  { %381 = vmatpush.msrb.mxu3 %v1618_v23  ;;  %1630 = vmatmul.msk.f32.vlgmr.msrb.gmra.mxu0 %vm222_vm0, %v1895_v17  ;;  %v616_v23 = vld [vmem:[#allocation5 + $0x180] sm:$0xff] }
  0x33   :  { %1631 = vmatmul.msk.f32.vlgmr.msrb.gmra.mxu1 %vm222_vm0, %v1895_v17  ;;  %1632 = vmatmul.msk.f32.vlgmr.msrb.gmra.mxu2 %vm222_vm0, %v1895_v17 }
  0x34   :  { %1633 = vmatmul.msk.f32.vlgmr.msrb.gmra.mxu3 %vm222_vm0, %v1895_v17  ;;  %1339 = vperm.xlu0 %1725, %v1277_v34  }
  0x35   :  { %767 = vmatpush.msra.mxu2 %v615_v36  ;;  %787 = vmatpush.msra.mxu3 %v631_v37 }
  0x37   :  { %768 = vmatpush.msra.mxu2 %v614_v38  ;;  %788 = vmatpush.msra.mxu3 %v630_v39 }
  0x39   :  { %769 = vmatpush.msra.mxu2 %v613_v40  ;;  %789 = vmatpush.msra.mxu3 %v629_v41 }
  0x3b   :  { %770 = vmatpush.msra.mxu2 %v612_v42  ;;  %790 = vmatpush.msra.mxu3 %v628_v43 }
  0x3c   :  { %1354 = vperm.xlu0 %1725, %v1280_v35  }
  0x3d   :  { %771 = vmatpush.msra.mxu2 %v611_v44  ;;  %791 = vmatpush.msra.mxu3 %v627_v45 }
  0x3f   :  { %772 = vmatpush.msra.mxu2 %v610_v46  ;;  %792 = vmatpush.msra.mxu3 %v626_v47 }
  0x41   :  { %773 = vmatpush.msra.mxu2 %v609_v51  ;;  %793 = vmatpush.msra.mxu3 %v625_v52  ;;  %v582_v52 = vld [vmem:[#allocation5 + $0x70] sm:$0xff] }
  0x43   :  { %774 = vmatpush.msra.mxu2 %v608_v55  ;;  %794 = vmatpush.msra.mxu3 %v624_v56  ;;  %v597_v55 = vld [vmem:[#allocation5 + $0xe8] sm:$0xff]  ;;  %v580_v56 = vld [vmem:[#allocation5 + $0x60] sm:$0xff] }
  0x45   :  { %775 = vmatpush.msra.mxu2 %v607_v58  ;;  %795 = vmatpush.msra.mxu3 %v623_v59  ;;  %v579_v59 = vld [vmem:[#allocation5 + $0x58] sm:$0xff] }
  0x47   :  { %776 = vmatpush.msra.mxu2 %v606_v1  ;;  %796 = vmatpush.msra.mxu3 %v622_v3  ;;  %v593_v1 = vld [vmem:[#allocation5 + $0xc8] sm:$0xff]  ;;  %v592_v3 = vld [vmem:[#allocation5 + $0xc0] sm:$0xff] }
  0x49   :  { %777 = vmatpush.msra.mxu2 %v605_v4  ;;  %797 = vmatpush.msra.mxu3 %v621_v5  ;;  %v575_v5 = vld [vmem:[#allocation5 + $0x38] sm:$0xff] }
  0x4b   :  { %778 = vmatpush.msra.mxu2 %v604_v7  ;;  %798 = vmatpush.msra.mxu3 %v620_v8  ;;  %v574_v7 = vld [vmem:[#allocation5 + $0x30] sm:$0xff] }
  0x4c   :  { %v590_v8 = vld [vmem:[#allocation5 + $0xb0] sm:$0xff] }
  0x4d   :  { %779 = vmatpush.msra.mxu2 %v603_v10  ;;  %799 = vmatpush.msra.mxu3 %v619_v11  ;;  %v573_v10 = vld [vmem:[#allocation5 + $0x28] sm:$0xff] }
  0x4e   :  { %v589_v11 = vld [vmem:[#allocation5 + $0xa8] sm:$0xff] }
  0x4f   :  { %780 = vmatpush.msra.mxu2 %v602_v15  ;;  %800 = vmatpush.msra.mxu3 %v618_v16  ;;  %v587_v15 = vld [vmem:[#allocation5 + $0x98] sm:$0xff] }
  0x51   :  { %781 = vmatpush.msra.mxu2 %v601_v18  ;;  %801 = vmatpush.msra.mxu3 %v617_v19  ;;  %v586_v18 = vld [vmem:[#allocation5 + $0x90] sm:$0xff]  ;;  %v569_v19 = vld [vmem:[#allocation5 + $0x8] sm:$0xff] }
  0x53   :  { %782 = vmatpush.msra.mxu2 %v600_v22  ;;  %802 = vmatpush.msra.mxu3 %v616_v23  ;;  %v585_v22 = vld [vmem:[#allocation5 + $0x88] sm:$0xff]  ;;  %v678_v23 = vld [vmem:[#allocation5 + $0x370] sm:$0xff] }
  0x80   :  { %v1967_v53 = vpop.permute.xlu0 %390 }
  0x9c   :  { %v243_v48 = vpop.f32.mrf.mxu0 }
  0x9d   :  { %v263_v49 = vpop.f32.mrf.mxu1 }
  0x9e   :  { %v387_v50 = vmax.f32 %v243_v48, %v263_v49  ;;  %v583_v49 = vld [vmem:[#allocation5 + $0x78] sm:$0xff] }
  0x9f   :  { %727 = vmatpush.msra.mxu0 %v583_v49  ;;  %v643_v49 = vld [vmem:[#allocation5 + $0x258] sm:$0xff] }
  0xa0   :  { %v393_v54 = vadd.f32 %v1967_v53, %v387_v50  ;;  %v599_v50 = vld [vmem:[#allocation5 + $0xf8] sm:$0xff] }
  0xa1   :  { %747 = vmatpush.msra.mxu1 %v599_v50  ;;  %728 = vmatpush.msra.mxu0 %v582_v52  ;;  %v659_v50 = vld [vmem:[#allocation5 + $0x2d8] sm:$0xff]  ;;  %v642_v52 = vld [vmem:[#allocation5 + $0x250] sm:$0xff] }
  0xa2   :  { %v1970_v57 = vmax.f32 %v393_v54, 0.0  ;;  %v581_v54 = vld [vmem:[#allocation5 + $0x68] sm:$0xff] }
  0xa3   :  { %v283_v63 = vpop.f32.mrf.mxu2  ;;  %729 = vmatpush.msra.mxu0 %v581_v54 }
  0xa4   :  { %395 = vst [vmem:[#allocation3] sm:$0x1] %v1970_v57  ;;  %v1634_v60 = vrot.slane %v1970_v57, 9  ;;  %v1635_v61 = vrot.slane %v1970_v57, 10  ;;  %v1636_v62 = vrot.slane %v1970_v57, 11  ;;  %v303_v0 = vpop.f32.mrf.mxu3 }
  0xa5   :  { %409 = vst.sshfl [vmem:[#allocation1] sm:$0xff pattern:$0x75316420] %v1970_v57  ;;  %v435_v2 = vmax.f32 %v283_v63, %v303_v0  ;;  %730 = vmatpush.msra.mxu0 %v580_v56  ;;  %v594_v63 = vld [vmem:[#allocation5 + $0xd0] sm:$0xff]  ;;  %v577_v0 = vld [vmem:[#allocation5 + $0x48] sm:$0xff] }
  0xa6   :  { %400 = vst [vmem:[#allocation3 + $0x4] sm:$0x1] %v1634_v60  ;;  %v595_v60 = vld [vmem:[#allocation5 + $0xd8] sm:$0xff]  ;;  %v657_v56 = vld [vmem:[#allocation5 + $0x2c8] sm:$0xff] }
  0xa7   :  { %404 = vst [vmem:[#allocation3 + $0x8] sm:$0x1] %v1635_v61  ;;  %v436_v6 = vadd.f32 %v435_v2, %v1967_v53  ;;  %731 = vmatpush.msra.mxu0 %v579_v59  ;;  %v576_v2 = vld [vmem:[#allocation5 + $0x40] sm:$0xff]  ;;  %v639_v59 = vld [vmem:[#allocation5 + $0x238] sm:$0xff] }
  0xa8   :  { %408 = vst [vmem:[#allocation3 + $0xc] sm:$0x1] %v1636_v62  ;;  %v578_v62 = vld [vmem:[#allocation5 + $0x50] sm:$0xff] }
  0xa9   :  { %v1978_v9 = vmax.f32 %v436_v6, 0.0  ;;  %732 = vmatpush.msra.mxu0 %v578_v62  ;;  %v591_v6 = vld [vmem:[#allocation5 + $0xb8] sm:$0xff]  ;;  %v638_v62 = vld [vmem:[#allocation5 + $0x230] sm:$0xff] }
  0xab   :  { %438 = vst [vmem:[#allocation3 + $0x1] sm:$0x1] %v1978_v9  ;;  %v1640_v12 = vrot.slane %v1978_v9, 9  ;;  %v1641_v14 = vrot.slane %v1978_v9, 10  ;;  %v1642_v17 = vrot.slane %v1978_v9, 11  ;;  %733 = vmatpush.msra.mxu0 %v577_v0  ;;  %v637_v0 = vld [vmem:[#allocation5 + $0x228] sm:$0xff] }
  0xac   :  { %v411_v13 = vld [vmem:[#allocation1 + $0x1] ss:$2 sm:$0xff] }
  0xad   :  { %414 = vst.sshfl [vmem:[#allocation1] sm:$0xff pattern:$0x75316420] %v1970_v57  ;;  %734 = vmatpush.msra.mxu0 %v576_v2  ;;  %v636_v2 = vld [vmem:[#allocation5 + $0x220] sm:$0xff] }
  0xae   :  { %413 = vst [vmem:[#allocation3 + $0x10] sm:$0x1] %v411_v13  ;;  %v588_v13 = vld [vmem:[#allocation5 + $0xa0] sm:$0xff] }
  0xaf   :  { %443 = vst [vmem:[#allocation3 + $0x5] sm:$0x1] %v1640_v12  ;;  %v323_v20 = vpop.f32.mrf.mxu0  ;;  %735 = vmatpush.msra.mxu0 %v575_v5  ;;  %v572_v12 = vld [vmem:[#allocation5 + $0x20] sm:$0xff] }
  0xb0   :  { %447 = vst [vmem:[#allocation3 + $0x9] sm:$0x1] %v1641_v14  ;;  %v343_v21 = vpop.f32.mrf.mxu1  ;;  %v571_v14 = vld [vmem:[#allocation5 + $0x18] sm:$0xff]  ;;  %v652_v5 = vld [vmem:[#allocation5 + $0x2a0] sm:$0xff] }
  0xb1   :  { %451 = vst [vmem:[#allocation3 + $0xd] sm:$0x1] %v1642_v17  ;;  %v478_v24 = vmax.f32 %v323_v20, %v343_v21  ;;  %736 = vmatpush.msra.mxu0 %v574_v7  ;;  %v570_v17 = vld [vmem:[#allocation5 + $0x10] sm:$0xff]  ;;  %v679_v20 = vld [vmem:[#allocation5 + $0x378] sm:$0xff] }
  0xb2   :  { %v695_v21 = vld [vmem:[#allocation5 + $0x3f8] sm:$0xff]  ;;  %847 = vmatpush.msrb.mxu2 %v679_v20  ;;  %v684_v20 = vld [vmem:[#allocation5 + $0x3a0] sm:$0xff] }
  0xb3   :  { %v479_v25 = vadd.f32 %v478_v24, %v1967_v53  ;;  %737 = vmatpush.msra.mxu0 %v573_v10  ;;  %867 = vmatpush.msrb.mxu3 %v695_v21  ;;  %v694_v24 = vld [vmem:[#allocation5 + $0x3f0] sm:$0xff]  ;;  %v687_v7 = vld [vmem:[#allocation5 + $0x3b8] sm:$0xff] }
  0xb4   :  { %v416_v26 = vld [vmem:[#allocation1 + $0x1] ss:$2 sm:$0xff]  ;;  %848 = vmatpush.msrb.mxu2 %v678_v23 }
  0xb5   :  { %421 = vst.sshfl [vmem:[#allocation1] sm:$0xff pattern:$0x75316420] %v1970_v57  ;;  %v1987_v27 = vmax.f32 %v479_v25, 0.0  ;;  %v1637_v28 = vrot.slane %v416_v26, 9  ;;  %738 = vmatpush.msra.mxu0 %v572_v12  ;;  %v677_v25 = vld [vmem:[#allocation5 + $0x368] sm:$0xff]  ;;  %868 = vmatpush.msrb.mxu3 %v694_v24 }
  0xb6   :  { %v363_v32 = vpop.f32.mrf.mxu2  ;;  %v568_v26 = vld [vmem:[#allocation5] sm:$0xff]  ;;  %849 = vmatpush.msrb.mxu2 %v677_v25  ;;  %v651_v10 = vld [vmem:[#allocation5 + $0x298] sm:$0xff]  ;;  %v669_v12 = vld [vmem:[#allocation5 + $0x328] sm:$0xff] }
  0xb7   :  { %481 = vst [vmem:[#allocation3 + $0x2] sm:$0x1] %v1987_v27  ;;  %v1646_v29 = vrot.slane %v1987_v27, 9  ;;  %v1647_v30 = vrot.slane %v1987_v27, 10  ;;  %v1648_v31 = vrot.slane %v1987_v27, 11  ;;  %v383_v33 = vpop.f32.mrf.mxu3  ;;  %739 = vmatpush.msra.mxu0 %v571_v14  ;;  %v667_v21 = vld [vmem:[#allocation5 + $0x318] sm:$0xff] }
  0xb8   :  { %v521_v34 = vmax.f32 %v363_v32, %v383_v33  ;;  %420 = vst [vmem:[#allocation3 + $0x14] sm:$0x1] %v1637_v28  ;;  %v584_v28 = vld [vmem:[#allocation5 + $0x80] sm:$0xff]  ;;  %v683_v24 = vld [vmem:[#allocation5 + $0x398] sm:$0xff]  ;;  %v666_v25 = vld [vmem:[#allocation5 + $0x310] sm:$0xff] }
  0xb9   :  { %486 = vst [vmem:[#allocation3 + $0x6] sm:$0x1] %v1646_v29  ;;  %740 = vmatpush.msra.mxu0 %v570_v17  ;;  %v693_v29 = vld [vmem:[#allocation5 + $0x3e8] sm:$0xff]  ;;  %v676_v32 = vld [vmem:[#allocation5 + $0x360] sm:$0xff] }
  0xba   :  { %490 = vst [vmem:[#allocation3 + $0xa] sm:$0x1] %v1647_v30  ;;  %v522_v35 = vadd.f32 %v521_v34, %v1967_v53  ;;  %v598_v53 = vld [vmem:[#allocation5 + $0xf0] sm:$0xff]  ;;  %v647_v30 = vld [vmem:[#allocation5 + $0x278] sm:$0xff]  ;;  %869 = vmatpush.msrb.mxu3 %v693_v29  ;;  %v692_v33 = vld [vmem:[#allocation5 + $0x3e0] sm:$0xff]  ;;  %850 = vmatpush.msrb.mxu2 %v676_v32 }
  0xbb   :  { %494 = vst [vmem:[#allocation3 + $0xe] sm:$0x1] %v1648_v31  ;;  %748 = vmatpush.msra.mxu1 %v598_v53  ;;  %741 = vmatpush.msra.mxu0 %v569_v19  ;;  %v663_v31 = vld [vmem:[#allocation5 + $0x2f8] sm:$0xff]  ;;  %v658_v53 = vld [vmem:[#allocation5 + $0x2d0] sm:$0xff]  ;;  %v633_v17 = vld [vmem:[#allocation5 + $0x208] sm:$0xff] }
  0xbc   :  { %v423_v36 = vld [vmem:[#allocation1 + $0x1] ss:$2 sm:$0xff]  ;;  %v1994_v37 = vmax.f32 %v522_v35, 0.0  ;;  %v646_v35 = vld [vmem:[#allocation5 + $0x270] sm:$0xff]  ;;  %870 = vmatpush.msrb.mxu3 %v692_v33  ;;  %v681_v29 = vld [vmem:[#allocation5 + $0x388] sm:$0xff] }
  0xbd   :  { %428 = vst.sshfl [vmem:[#allocation1] sm:$0xff pattern:$0x75316420] %v1970_v57  ;;  %v1638_v38 = vrot.slane %v423_v36, 10  ;;  %749 = vmatpush.msra.mxu1 %v597_v55  ;;  %v596_v57 = vld [vmem:[#allocation5 + $0xe0] sm:$0xff]  ;;  %742 = vmatpush.msra.mxu0 %v568_v26  ;;  %v662_v36 = vld [vmem:[#allocation5 + $0x2f0] sm:$0xff] }
  0xbe   :  { %524 = vst [vmem:[#allocation3 + $0x3] sm:$0x1] %v1994_v37  ;;  %v1652_v39 = vrot.slane %v1994_v37, 9  ;;  %v1653_v40 = vrot.slane %v1994_v37, 10  ;;  %v1654_v41 = vrot.slane %v1994_v37, 11  ;;  %v641_v55 = vld [vmem:[#allocation5 + $0x248] sm:$0xff] }
  0xbf   :  { %427 = vst [vmem:[#allocation3 + $0x18] sm:$0x1] %v1638_v38  ;;  %750 = vmatpush.msra.mxu1 %v596_v57  ;;  %807 = vmatpush.msrb.mxu0 %v647_v30  ;;  %v675_v38 = vld [vmem:[#allocation5 + $0x358] sm:$0xff]  ;;  %v640_v57 = vld [vmem:[#allocation5 + $0x240] sm:$0xff]  ;;  %v682_v26 = vld [vmem:[#allocation5 + $0x390] sm:$0xff] }
  0xc0   :  { %529 = vst [vmem:[#allocation3 + $0x7] sm:$0x1] %v1652_v39  ;;  %v691_v39 = vld [vmem:[#allocation5 + $0x3d8] sm:$0xff]  ;;  %851 = vmatpush.msrb.mxu2 %v675_v38  ;;  %v668_v19 = vld [vmem:[#allocation5 + $0x320] sm:$0xff] }
  0xc1   :  { %533 = vst [vmem:[#allocation3 + $0xb] sm:$0x1] %v1653_v40  ;;  %751 = vmatpush.msra.mxu1 %v595_v60  ;;  %v645_v40 = vld [vmem:[#allocation5 + $0x268] sm:$0xff]  ;;  %808 = vmatpush.msrb.mxu0 %v646_v35  ;;  %v655_v60 = vld [vmem:[#allocation5 + $0x2b8] sm:$0xff]  ;;  %v648_v23 = vld [vmem:[#allocation5 + $0x280] sm:$0xff] }
  0xc2   :  { %537 = vst [vmem:[#allocation3 + $0xf] sm:$0x1] %v1654_v41  ;;  %v661_v41 = vld [vmem:[#allocation5 + $0x2e8] sm:$0xff]  ;;  %871 = vmatpush.msrb.mxu3 %v691_v39  ;;  %v664_v32 = vld [vmem:[#allocation5 + $0x300] sm:$0xff] }
  0xc3   :  { %752 = vmatpush.msra.mxu1 %v594_v63  ;;  %809 = vmatpush.msrb.mxu0 %v645_v40  ;;  %v654_v63 = vld [vmem:[#allocation5 + $0x2b0] sm:$0xff]  ;;  %v680_v33 = vld [vmem:[#allocation5 + $0x380] sm:$0xff] }
  0xc4   :  { %v430_v42 = vld [vmem:[#allocation1 + $0x1] ss:$2 sm:$0xff] }
  0xc5   :  { %452 = vst.sshfl [vmem:[#allocation1] sm:$0xff pattern:$0x75316420] %v1978_v9  ;;  %v1639_v43 = vrot.slane %v430_v42, 11  ;;  %753 = vmatpush.msra.mxu1 %v593_v1  ;;  %v653_v1 = vld [vmem:[#allocation5 + $0x2a8] sm:$0xff] }
  0xc7   :  { %434 = vst [vmem:[#allocation3 + $0x1c] sm:$0x1] %v1639_v43  ;;  %754 = vmatpush.msra.mxu1 %v592_v3  ;;  %v674_v43 = vld [vmem:[#allocation5 + $0x350] sm:$0xff]  ;;  %v672_v3 = vld [vmem:[#allocation5 + $0x340] sm:$0xff] }
  0xc8   :  { %852 = vmatpush.msrb.mxu2 %v674_v43  ;;  %v564_v35 = vld [vmem:[#allocation3] sm:$0xff] }
  0xc9   :  { %v565_v44 = vld [vmem:[#allocation3 + $0x8] sm:$0xff]  ;;  %755 = vmatpush.msra.mxu1 %v591_v6  ;;  %v671_v6 = vld [vmem:[#allocation5 + $0x338] sm:$0xff] }
  0xca   :  { %706 = vst [vmem:[#allocation1 + $0x10] ss:$2 sm:$0xff] %v565_v44  ;;  %v690_v44 = vld [vmem:[#allocation5 + $0x3d0] sm:$0xff] }
  0xcb   :  { %756 = vmatpush.msra.mxu1 %v590_v8  ;;  %872 = vmatpush.msrb.mxu3 %v690_v44  ;;  %v670_v8 = vld [vmem:[#allocation5 + $0x330] sm:$0xff] }
  0xcc   :  { %v454_v45 = vld [vmem:[#allocation1 + $0x1] ss:$2 sm:$0xff] }
  0xcd   :  { %457 = vst.sshfl [vmem:[#allocation1] sm:$0xff pattern:$0x75316420] %v1978_v9  ;;  %757 = vmatpush.msra.mxu1 %v589_v11  ;;  %v686_v11 = vld [vmem:[#allocation5 + $0x3b0] sm:$0xff] }
  0xce   :  { %456 = vst [vmem:[#allocation3 + $0x11] sm:$0x1] %v454_v45  ;;  %v644_v45 = vld [vmem:[#allocation5 + $0x260] sm:$0xff] }
  0xcf   :  { %758 = vmatpush.msra.mxu1 %v588_v13  ;;  %810 = vmatpush.msrb.mxu0 %v644_v45  ;;  %v685_v13 = vld [vmem:[#allocation5 + $0x3a8] sm:$0xff] }
  0xd1   :  { %v713_v46 = vld.sshfl [vmem:[#allocation1 + $0x10] sm:$0xff pattern:$0x75316420]  ;;  %v714_v47 = vld.sshfl [vmem:[#allocation1 + $0x18] sm:$0xff pattern:$0x75316420]  ;;  %759 = vmatpush.msra.mxu1 %v587_v15  ;;  %811 = vmatpush.msrb.mxu0 %v643_v49 }
  0xd2   :  { %783 = vmatmul.f32.vlgmr.msra.gmra.mxu2 %v713_v46  ;;  %803 = vmatmul.f32.vlgmr.msra.gmra.mxu3 %v714_v47  ;;  %v660_v46 = vld [vmem:[#allocation5 + $0x2e0] sm:$0xff]  ;;  %v673_v47 = vld [vmem:[#allocation5 + $0x348] sm:$0xff]  ;;  %v634_v15 = vld [vmem:[#allocation5 + $0x210] sm:$0xff] }
  0xd3   :  { %760 = vmatpush.msra.mxu1 %v586_v18  ;;  %853 = vmatpush.msrb.mxu2 %v673_v47  ;;  %v649_v18 = vld [vmem:[#allocation5 + $0x288] sm:$0xff]  ;;  %v960_v47 = vld [vmem:[#allocation7 + $0x240] sm:$0xff]  ;;  %v962_v49 = vld [vmem:[#allocation7 + $0x250] sm:$0xff] }
  0xd4   :  { %v459_v48 = vld [vmem:[#allocation1 + $0x1] ss:$2 sm:$0xff]  ;;  %812 = vmatpush.msrb.mxu0 %v642_v52  ;;  %v953_v52 = vld [vmem:[#allocation7 + $0x208] sm:$0xff] }
  0xd5   :  { %464 = vst.sshfl [vmem:[#allocation1] sm:$0xff pattern:$0x75316420] %v1978_v9  ;;  %v1643_v51 = vrot.slane %v459_v48, 9  ;;  %761 = vmatpush.msra.mxu1 %v585_v22  ;;  %v689_v48 = vld [vmem:[#allocation5 + $0x3c8] sm:$0xff]  ;;  %854 = vmatpush.msrb.mxu2 %v672_v3  ;;  %v632_v22 = vld [vmem:[#allocation5 + $0x200] sm:$0xff] }
  0xd6   :  { %873 = vmatpush.msrb.mxu3 %v689_v48  ;;  %813 = vmatpush.msrb.mxu0 %v641_v55  ;;  %v961_v48 = vld [vmem:[#allocation7 + $0x248] sm:$0xff]  ;;  %v944_v55 = vld [vmem:[#allocation7 + $0x1c0] sm:$0xff] }
  0xd7   :  { %463 = vst [vmem:[#allocation3 + $0x15] sm:$0x1] %v1643_v51  ;;  %762 = vmatpush.msra.mxu1 %v584_v28  ;;  %855 = vmatpush.msrb.mxu2 %v671_v6  ;;  %v665_v28 = vld [vmem:[#allocation5 + $0x308] sm:$0xff]  ;;  %v912_v6 = vld [vmem:[#allocation7 + $0xc0] sm:$0xff] }
  0xd8   :  { %814 = vmatpush.msrb.mxu0 %v640_v57  ;;  %v946_v57 = vld [vmem:[#allocation7 + $0x1d0] sm:$0xff]  ;;  %v921_v3 = vld [vmem:[#allocation7 + $0x108] sm:$0xff] }
  0xd9   :  { %827 = vmatpush.msrb.mxu1 %v663_v31  ;;  %856 = vmatpush.msrb.mxu2 %v670_v8  ;;  %v914_v8 = vld [vmem:[#allocation7 + $0xd0] sm:$0xff] }
  0xda   :  { %815 = vmatpush.msrb.mxu0 %v639_v59  ;;  %v936_v59 = vld [vmem:[#allocation7 + $0x180] sm:$0xff] }
  0xdb   :  { %828 = vmatpush.msrb.mxu1 %v662_v36  ;;  %857 = vmatpush.msrb.mxu2 %v669_v12  ;;  %v906_v12 = vld [vmem:[#allocation7 + $0x90] sm:$0xff] }
  0xdc   :  { %v466_v58 = vld [vmem:[#allocation1 + $0x1] ss:$2 sm:$0xff]  ;;  %816 = vmatpush.msrb.mxu0 %v638_v62 }
  0xdd   :  { %471 = vst.sshfl [vmem:[#allocation1] sm:$0xff pattern:$0x75316420] %v1978_v9  ;;  %v1644_v61 = vrot.slane %v466_v58, 10  ;;  %829 = vmatpush.msrb.mxu1 %v661_v41  ;;  %v656_v58 = vld [vmem:[#allocation5 + $0x2c0] sm:$0xff]  ;;  %858 = vmatpush.msrb.mxu2 %v668_v19  ;;  %v939_v62 = vld [vmem:[#allocation7 + $0x198] sm:$0xff] }
  0xde   :  { %817 = vmatpush.msrb.mxu0 %v637_v0  ;;  %v930_v0 = vld [vmem:[#allocation7 + $0x150] sm:$0xff]  ;;  %v889_v19 = vld [vmem:[#allocation7 + $0x8] sm:$0xff] }
  0xdf   :  { %470 = vst [vmem:[#allocation3 + $0x19] sm:$0x1] %v1644_v61  ;;  %830 = vmatpush.msrb.mxu1 %v660_v46  ;;  %859 = vmatpush.msrb.mxu2 %v667_v21  ;;  %v891_v21 = vld [vmem:[#allocation7 + $0x18] sm:$0xff] }
  0xe0   :  { %818 = vmatpush.msrb.mxu0 %v636_v2  ;;  %v920_v2 = vld [vmem:[#allocation7 + $0x100] sm:$0xff] }
  0xe1   :  { %831 = vmatpush.msrb.mxu1 %v659_v50  ;;  %860 = vmatpush.msrb.mxu2 %v666_v25  ;;  %v963_v50 = vld [vmem:[#allocation7 + $0x258] sm:$0xff] }
  0xe2   :  { %v967_v25 = vld [vmem:[#allocation7 + $0x278] sm:$0xff] }
  0xe3   :  { %832 = vmatpush.msrb.mxu1 %v658_v53  ;;  %861 = vmatpush.msrb.mxu2 %v665_v28  ;;  %v954_v53 = vld [vmem:[#allocation7 + $0x210] sm:$0xff]  ;;  %v957_v28 = vld [vmem:[#allocation7 + $0x228] sm:$0xff] }
  0xe4   :  { %v473_v4 = vld [vmem:[#allocation1 + $0x1] ss:$2 sm:$0xff] }
  0xe5   :  { %495 = vst.sshfl [vmem:[#allocation1] sm:$0xff pattern:$0x75316420] %v1987_v27  ;;  %v1645_v9 = vrot.slane %v473_v4, 11  ;;  %833 = vmatpush.msrb.mxu1 %v657_v56  ;;  %v688_v4 = vld [vmem:[#allocation5 + $0x3c0] sm:$0xff]  ;;  %862 = vmatpush.msrb.mxu2 %v664_v32  ;;  %v945_v56 = vld [vmem:[#allocation7 + $0x1c8] sm:$0xff] }
  0xe6   :  { %874 = vmatpush.msrb.mxu3 %v688_v4  ;;  %v922_v4 = vld [vmem:[#allocation7 + $0x110] sm:$0xff]  ;;  %v949_v32 = vld [vmem:[#allocation7 + $0x1e8] sm:$0xff] }
  0xe7   :  { %477 = vst [vmem:[#allocation3 + $0x1d] sm:$0x1] %v1645_v9  ;;  %834 = vmatpush.msrb.mxu1 %v656_v58  ;;  %v635_v9 = vld [vmem:[#allocation5 + $0x218] sm:$0xff]  ;;  %1036 = vmatpush.msra.mxu2 %v962_v49 }
  0xe8   :  { %875 = vmatpush.msrb.mxu3 %v687_v7  ;;  %819 = vmatpush.msrb.mxu0 %v635_v9  ;;  %v947_v58 = vld [vmem:[#allocation7 + $0x1d8] sm:$0xff]  ;;  %v913_v7 = vld [vmem:[#allocation7 + $0xc8] sm:$0xff] }
  0xe9   :  { %835 = vmatpush.msrb.mxu1 %v655_v60  ;;  %1037 = vmatpush.msra.mxu2 %v954_v53  ;;  %v937_v60 = vld [vmem:[#allocation7 + $0x188] sm:$0xff]  ;;  %v915_v9 = vld [vmem:[#allocation7 + $0xd8] sm:$0xff] }
  0xea   :  { %876 = vmatpush.msrb.mxu3 %v686_v11  ;;  %820 = vmatpush.msrb.mxu0 %v634_v15  ;;  %v905_v11 = vld [vmem:[#allocation7 + $0x88] sm:$0xff]  ;;  %v927_v49 = vld [vmem:[#allocation7 + $0x138] sm:$0xff] }
  0xeb   :  { %836 = vmatpush.msrb.mxu1 %v654_v63  ;;  %1038 = vmatpush.msra.mxu2 %v946_v57  ;;  %v928_v63 = vld [vmem:[#allocation7 + $0x140] sm:$0xff]  ;;  %v897_v15 = vld [vmem:[#allocation7 + $0x48] sm:$0xff]  ;;  %v919_v53 = vld [vmem:[#allocation7 + $0xf8] sm:$0xff] }
  0xec   :  { %v497_v16 = vld [vmem:[#allocation1 + $0x1] ss:$2 sm:$0xff]  ;;  %877 = vmatpush.msrb.mxu3 %v685_v13  ;;  %821 = vmatpush.msrb.mxu0 %v633_v17 }
  0xed   :  { %500 = vst.sshfl [vmem:[#allocation1] sm:$0xff pattern:$0x75316420] %v1987_v27  ;;  %837 = vmatpush.msrb.mxu1 %v653_v1  ;;  %v931_v1 = vld [vmem:[#allocation7 + $0x158] sm:$0xff] }
  0xee   :  { %499 = vst [vmem:[#allocation3 + $0x12] sm:$0x1] %v497_v16  ;;  %v650_v16 = vld [vmem:[#allocation5 + $0x290] sm:$0xff]  ;;  %878 = vmatpush.msrb.mxu3 %v684_v20  ;;  %822 = vmatpush.msrb.mxu0 %v632_v22  ;;  %v907_v13 = vld [vmem:[#allocation7 + $0x98] sm:$0xff]  ;;  %v964_v22 = vld [vmem:[#allocation7 + $0x260] sm:$0xff] }
  0xef   :  { %838 = vmatpush.msrb.mxu1 %v652_v5  ;;  %v923_v5 = vld [vmem:[#allocation7 + $0x118] sm:$0xff]  ;;  %v890_v20 = vld [vmem:[#allocation7 + $0x10] sm:$0xff] }
  0xf0   :  { %879 = vmatpush.msrb.mxu3 %v683_v24  ;;  %v899_v17 = vld [vmem:[#allocation7 + $0x58] sm:$0xff]  ;;  %v966_v24 = vld [vmem:[#allocation7 + $0x270] sm:$0xff] }
  0xf1   :  { %839 = vmatpush.msrb.mxu1 %v651_v10  ;;  %v904_v10 = vld [vmem:[#allocation7 + $0x80] sm:$0xff] }
  0xf2   :  { %880 = vmatpush.msrb.mxu3 %v682_v26  ;;  %v956_v26 = vld [vmem:[#allocation7 + $0x220] sm:$0xff] }
  0xf3   :  { %840 = vmatpush.msrb.mxu1 %v650_v16  ;;  %v898_v16 = vld [vmem:[#allocation7 + $0x50] sm:$0xff] }
  0xf4   :  { %v502_v34 = vld [vmem:[#allocation1 + $0x1] ss:$2 sm:$0xff]  ;;  %881 = vmatpush.msrb.mxu3 %v681_v29  ;;  %v958_v29 = vld [vmem:[#allocation7 + $0x230] sm:$0xff] }
  0xf5   :  { %507 = vst.sshfl [vmem:[#allocation1] sm:$0xff pattern:$0x75316420] %v1987_v27  ;;  %v1649_v42 = vrot.slane %v502_v34, 9  ;;  %841 = vmatpush.msrb.mxu1 %v649_v18  ;;  %v888_v18 = vld [vmem:[#allocation7] sm:$0xff] }
  0xf6   :  { %882 = vmatpush.msrb.mxu3 %v680_v33  ;;  %v950_v33 = vld [vmem:[#allocation7 + $0x1f0] sm:$0xff] }
  0xf7   :  { %506 = vst [vmem:[#allocation3 + $0x16] sm:$0x1] %v1649_v42  ;;  %842 = vmatpush.msrb.mxu1 %v648_v23  ;;  %v965_v23 = vld [vmem:[#allocation7 + $0x268] sm:$0xff] }
  0xf8   :  { %1056 = vmatpush.msra.mxu3 %v963_v50  ;;  %v916_v50 = vld [vmem:[#allocation7 + $0xe0] sm:$0xff] }
  0xfc   :  { %v509_v51 = vld [vmem:[#allocation1 + $0x1] ss:$2 sm:$0xff] }
  0xfd   :  { %514 = vst.sshfl [vmem:[#allocation1] sm:$0xff pattern:$0x75316420] %v1987_v27  ;;  %v1650_v54 = vrot.slane %v509_v51, 10  ;;  %v952_v51 = vld [vmem:[#allocation7 + $0x200] sm:$0xff] }
  0xff   :  { %513 = vst [vmem:[#allocation3 + $0x1a] sm:$0x1] %v1650_v54  ;;  %v955_v54 = vld [vmem:[#allocation7 + $0x218] sm:$0xff] }
 0x100   :  { %1057 = vmatpush.msra.mxu3 %v955_v54 }
 0x102   :  { %1058 = vmatpush.msra.mxu3 %v947_v58  ;;  %v910_v58 = vld [vmem:[#allocation7 + $0xb0] sm:$0xff] }
 0x104   :  { %v516_v61 = vld [vmem:[#allocation1 + $0x1] ss:$2 sm:$0xff]  ;;  %1059 = vmatpush.msra.mxu3 %v939_v62  ;;  %v902_v62 = vld [vmem:[#allocation7 + $0x70] sm:$0xff] }
 0x105   :  { %538 = vst.sshfl [vmem:[#allocation1] sm:$0xff pattern:$0x75316420] %v1994_v37  ;;  %v1651_v27 = vrot.slane %v516_v61, 11  ;;  %v938_v61 = vld [vmem:[#allocation7 + $0x190] sm:$0xff] }
 0x106   :  { %1039 = vmatpush.msra.mxu2 %v938_v61  ;;  %1060 = vmatpush.msra.mxu3 %v931_v1  ;;  %v901_v61 = vld [vmem:[#allocation7 + $0x68] sm:$0xff] }
 0x107   :  { %520 = vst [vmem:[#allocation3 + $0x1e] sm:$0x1] %v1651_v27  ;;  %v929_v27 = vld [vmem:[#allocation7 + $0x148] sm:$0xff] }
 0x108   :  { %1040 = vmatpush.msra.mxu2 %v930_v0  ;;  %1061 = vmatpush.msra.mxu3 %v923_v5  ;;  %v892_v0 = vld [vmem:[#allocation7 + $0x20] sm:$0xff]  ;;  %v893_v1 = vld [vmem:[#allocation7 + $0x28] sm:$0xff] }
 0x10a   :  { %1041 = vmatpush.msra.mxu2 %v922_v4  ;;  %1062 = vmatpush.msra.mxu3 %v915_v9  ;;  %v895_v4 = vld [vmem:[#allocation7 + $0x38] sm:$0xff] }
 0x10c   :  { %v540_v14 = vld [vmem:[#allocation1 + $0x1] ss:$2 sm:$0xff]  ;;  %1042 = vmatpush.msra.mxu2 %v914_v8  ;;  %1063 = vmatpush.msra.mxu3 %v907_v13 }
 0x10d   :  { %543 = vst.sshfl [vmem:[#allocation1] sm:$0xff pattern:$0x75316420] %v1994_v37 }
 0x10e   :  { %542 = vst [vmem:[#allocation3 + $0x13] sm:$0x1] %v540_v14  ;;  %v896_v14 = vld [vmem:[#allocation7 + $0x40] sm:$0xff]  ;;  %1043 = vmatpush.msra.mxu2 %v906_v12  ;;  %1064 = vmatpush.msra.mxu3 %v899_v17 }
 0x110   :  { %1044 = vmatpush.msra.mxu2 %v898_v16  ;;  %1065 = vmatpush.msra.mxu3 %v891_v21  ;;  %v2019_v16 = vld [vmem:[%s2260_s6] sm:$0xff] }
 0x111   :  { %v970_v17 = vperm.slane %v2019_v16, 0 }
 0x112   :  { %1045 = vmatpush.msra.mxu2 %v890_v20 }
 0x114   :  { %v545_v30 = vld [vmem:[#allocation1 + $0x1] ss:$2 sm:$0xff] }
 0x115   :  { %550 = vst.sshfl [vmem:[#allocation1] sm:$0xff pattern:$0x75316420] %v1994_v37  ;;  %v1655_v31 = vrot.slane %v545_v30, 9  ;;  %v959_v30 = vld [vmem:[#allocation7 + $0x238] sm:$0xff] }
 0x117   :  { %549 = vst [vmem:[#allocation3 + $0x17] sm:$0x1] %v1655_v31  ;;  %v948_v31 = vld [vmem:[#allocation7 + $0x1e0] sm:$0xff] }
 0x11c   :  { %v552_v34 = vld [vmem:[#allocation1 + $0x1] ss:$2 sm:$0xff] }
 0x11d   :  { %557 = vst.sshfl [vmem:[#allocation1] sm:$0xff pattern:$0x75316420] %v1994_v37  ;;  %v1656_v36 = vrot.slane %v552_v34, 10  ;;  %v951_v34 = vld [vmem:[#allocation7 + $0x1f8] sm:$0xff] }
 0x11e   :  { %704 = vst [vmem:[#allocation1] ss:$2 sm:$0xff] %v564_v35  ;;  %v566_v38 = vld [vmem:[#allocation3 + $0x10] sm:$0xff]  ;;  %v940_v35 = vld [vmem:[#allocation7 + $0x1a0] sm:$0xff] }
 0x11f   :  { %708 = vst [vmem:[#allocation1 + $0x20] ss:$2 sm:$0xff] %v566_v38  ;;  %v1728_v38 = vld [vmem:[%s2258_s4] ss:$0 sm:$0xff] }
 0x120   :  { %556 = vst [vmem:[#allocation3 + $0x1b] sm:$0x1] %v1656_v36  ;;  %v941_v36 = vld [vmem:[#allocation7 + $0x1a8] sm:$0xff] }
 0x124   :  { %v559_v39 = vld [vmem:[#allocation1 + $0x1] ss:$2 sm:$0xff] }
 0x125   :  { %v1657_v40 = vrot.slane %v559_v39, 11  ;;  %v711_v41 = vld.sshfl [vmem:[#allocation1] sm:$0xff pattern:$0x75316420]  ;;  %v942_v39 = vld [vmem:[#allocation7 + $0x1b0] sm:$0xff] }
 0x126   :  { %743 = vmatmul.f32.vlgmr.msra.gmra.mxu0 %v711_v41  ;;  %v712_v42 = vld.sshfl [vmem:[#allocation1 + $0x8] sm:$0xff pattern:$0x75316420]  ;;  %v715_v43 = vld.sshfl [vmem:[#allocation1 + $0x20] sm:$0xff pattern:$0x75316420] }
 0x127   :  { %563 = vst [vmem:[#allocation3 + $0x1f] sm:$0x1] %v1657_v40  ;;  %763 = vmatmul.f32.vlgmr.msra.gmra.mxu1 %v712_v42  ;;  %v716_v44 = vld.sshfl [vmem:[#allocation1 + $0x28] sm:$0xff pattern:$0x75316420]  ;;  %996 = vmatpush.msra.mxu0 %v960_v47  ;;  %v943_v40 = vld [vmem:[#allocation7 + $0x1b8] sm:$0xff] }
 0x128   :  { %1016 = vmatpush.msra.mxu1 %v961_v48  ;;  %v932_v41 = vld [vmem:[#allocation7 + $0x160] sm:$0xff]  ;;  %v933_v42 = vld [vmem:[#allocation7 + $0x168] sm:$0xff]  ;;  %v926_v48 = vld [vmem:[#allocation7 + $0x130] sm:$0xff] }
 0x129   :  { %997 = vmatpush.msra.mxu0 %v952_v51  ;;  %v917_v51 = vld [vmem:[#allocation7 + $0xe8] sm:$0xff] }
 0x12a   :  { %1017 = vmatpush.msra.mxu1 %v953_v52  ;;  %v918_v52 = vld [vmem:[#allocation7 + $0xf0] sm:$0xff] }
 0x12b   :  { %998 = vmatpush.msra.mxu0 %v944_v55  ;;  %v908_v55 = vld [vmem:[#allocation7 + $0xa0] sm:$0xff] }
 0x12c   :  { %1018 = vmatpush.msra.mxu1 %v945_v56  ;;  %v909_v56 = vld [vmem:[#allocation7 + $0xa8] sm:$0xff] }
 0x12d   :  { %999 = vmatpush.msra.mxu0 %v936_v59  ;;  %v911_v59 = vld [vmem:[#allocation7 + $0xb8] sm:$0xff] }
 0x12e   :  { %823 = vmatmul.f32.vlgmr.msrb.gmra.mxu0 %v715_v43  ;;  %v567_v45 = vld [vmem:[#allocation3 + $0x18] sm:$0xff]  ;;  %1019 = vmatpush.msra.mxu1 %v937_v60  ;;  %v900_v60 = vld [vmem:[#allocation7 + $0x60] sm:$0xff] }
 0x12f   :  { %843 = vmatmul.f32.vlgmr.msrb.gmra.mxu1 %v716_v44  ;;  %710 = vst [vmem:[#allocation1 + $0x30] ss:$2 sm:$0xff] %v567_v45  ;;  %1000 = vmatpush.msra.mxu0 %v928_v63  ;;  %v934_v44 = vld [vmem:[#allocation7 + $0x170] sm:$0xff]  ;;  %v935_v45 = vld [vmem:[#allocation7 + $0x178] sm:$0xff] }
 0x130   :  { %1020 = vmatpush.msra.mxu1 %v929_v27  ;;  %v903_v63 = vld [vmem:[#allocation7 + $0x78] sm:$0xff] }
 0x131   :  { %1001 = vmatpush.msra.mxu0 %v920_v2 }
 0x132   :  { %1021 = vmatpush.msra.mxu1 %v921_v3  ;;  %v894_v3 = vld [vmem:[#allocation7 + $0x30] sm:$0xff] }
 0x133   :  { %1002 = vmatpush.msra.mxu0 %v912_v6 }
 0x134   :  { %1022 = vmatpush.msra.mxu1 %v913_v7 }
 0x135   :  { %1003 = vmatpush.msra.mxu0 %v904_v10 }
 0x136   :  { %v717_v37 = vld.sshfl [vmem:[#allocation1 + $0x30] sm:$0xff pattern:$0x75316420]  ;;  %v718_v46 = vld.sshfl [vmem:[#allocation1 + $0x38] sm:$0xff pattern:$0x75316420]  ;;  %1023 = vmatpush.msra.mxu1 %v905_v11 }
 0x137   :  { %863 = vmatmul.f32.vlgmr.msrb.gmra.mxu2 %v717_v37  ;;  %883 = vmatmul.f32.vlgmr.msrb.gmra.mxu3 %v718_v46  ;;  %v924_v37 = vld [vmem:[#allocation7 + $0x120] sm:$0xff]  ;;  %v925_v46 = vld [vmem:[#allocation7 + $0x128] sm:$0xff] }
 0x138   :  { %1004 = vmatpush.msra.mxu0 %v896_v14  ;;  %1024 = vmatpush.msra.mxu1 %v897_v15 }
 0x139   :  { %1116 = vmatpush.msrb.mxu2 %v966_v24  ;;  %1136 = vmatpush.msrb.mxu3 %v967_v25  ;;  %v972_v25 = vperm.slane %v2019_v16, 2 }
 0x13a   :  { %1005 = vmatpush.msra.mxu0 %v888_v18  ;;  %1025 = vmatpush.msra.mxu1 %v889_v19  ;;  %v971_v18 = vperm.slane %v2019_v16, 1 }
 0x13b   :  { %1117 = vmatpush.msrb.mxu2 %v958_v29  ;;  %1137 = vmatpush.msrb.mxu3 %v959_v30 }
 0x13c   :  { %1076 = vmatpush.msrb.mxu0 %v964_v22  ;;  %1096 = vmatpush.msrb.mxu1 %v965_v23 }
 0x13d   :  { %1118 = vmatpush.msrb.mxu2 %v950_v33  ;;  %1138 = vmatpush.msrb.mxu3 %v951_v34 }
 0x13e   :  { %1077 = vmatpush.msrb.mxu0 %v956_v26  ;;  %1097 = vmatpush.msrb.mxu1 %v957_v28  ;;  %v973_v26 = vperm.slane %v2019_v16, 3 }
 0x13f   :  { %1119 = vmatpush.msrb.mxu2 %v942_v39  ;;  %1139 = vmatpush.msrb.mxu3 %v943_v40 }
 0x140   :  { %1078 = vmatpush.msrb.mxu0 %v948_v31  ;;  %1098 = vmatpush.msrb.mxu1 %v949_v32  ;;  %v974_v32 = vperm.slane %v2019_v16, 4 }
 0x141   :  { %1120 = vmatpush.msrb.mxu2 %v934_v44  ;;  %1140 = vmatpush.msrb.mxu3 %v935_v45  ;;  %v975_v45 = vperm.slane %v2019_v16, 5 }
 0x142   :  { %1079 = vmatpush.msrb.mxu0 %v940_v35  ;;  %1099 = vmatpush.msrb.mxu1 %v941_v36  ;;  %v1267_v36 = vld [vmem:[%s2262_s8 + $0x8] sm:$0xff] }
 0x143   :  { %1121 = vmatpush.msrb.mxu2 %v926_v48  ;;  %1141 = vmatpush.msrb.mxu3 %v927_v49 }
 0x144   :  { %1080 = vmatpush.msrb.mxu0 %v932_v41  ;;  %1100 = vmatpush.msrb.mxu1 %v933_v42 }
 0x145   :  { %1122 = vmatpush.msrb.mxu2 %v918_v52  ;;  %1142 = vmatpush.msrb.mxu3 %v919_v53  ;;  %v976_v52 = vperm.slane %v2019_v16, 6 }
 0x146   :  { %1081 = vmatpush.msrb.mxu0 %v924_v37  ;;  %1101 = vmatpush.msrb.mxu1 %v925_v46 }
 0x147   :  { %1123 = vmatpush.msrb.mxu2 %v910_v58  ;;  %1143 = vmatpush.msrb.mxu3 %v911_v59 }
 0x148   :  { %1082 = vmatpush.msrb.mxu0 %v916_v50  ;;  %1102 = vmatpush.msrb.mxu1 %v917_v51 }
 0x149   :  { %1124 = vmatpush.msrb.mxu2 %v902_v62  ;;  %1144 = vmatpush.msrb.mxu3 %v903_v63 }
 0x14a   :  { %1083 = vmatpush.msrb.mxu0 %v908_v55  ;;  %1103 = vmatpush.msrb.mxu1 %v909_v56  ;;  %v1268_v56 = vld [vmem:[%s2262_s8 + $0x10] sm:$0xff] }
 0x14b   :  { %1125 = vmatpush.msrb.mxu2 %v894_v3  ;;  %1145 = vmatpush.msrb.mxu3 %v895_v4  ;;  %v1272_v4 = vld [vmem:[%s2262_s8 + $0x30] sm:$0xff] }
 0x14c   :  { %1084 = vmatpush.msrb.mxu0 %v900_v60  ;;  %1104 = vmatpush.msrb.mxu1 %v901_v61  ;;  %v977_v60 = vperm.slane %v2019_v16, 7 }
 0x14d   :  { %1289 = vperm.xlu1 %1726, %v1267_v36   ;;  %v1259_v36 = vld [vmem:[%s2261_s7 + $0x68] sm:$0xff] }
 0x14e   :  { %1085 = vmatpush.msrb.mxu0 %v892_v0  ;;  %1105 = vmatpush.msrb.mxu1 %v893_v1 }
 0x155   :  { %v784_v27 = vpop.f32.mrf.mxu2  ;;  %v804_v5 = vpop.f32.mrf.mxu3  ;;  %1294 = vperm.xlu1 %1726, %v1268_v56  }
 0x15d   :  { %1314 = vperm.xlu1 %1726, %v1272_v4  }
 0x1a3   :  { %v744_v43 = vpop.f32.mrf.mxu0 }
 0x1a4   :  { %v745_v47 = vadd.f32 %v1728_v38, %v744_v43  ;;  %v764_v54 = vpop.f32.mrf.mxu1 }
 0x1a6   :  { %v765_v57 = vadd.f32 %v764_v54, %v745_v47 }
 0x1a8   :  { %v785_v2 = vadd.f32 %v784_v27, %v765_v57 }
 0x1aa   :  { %v805_v6 = vadd.f32 %v804_v5, %v785_v2 }
 0x1ab   :  { %v824_v7 = vpop.f32.mrf.mxu0 }
 0x1ac   :  { %v825_v8 = vadd.f32 %v824_v7, %v805_v6  ;;  %v844_v9 = vpop.f32.mrf.mxu1 }
 0x1ae   :  { %v845_v10 = vadd.f32 %v844_v9, %v825_v8 }
 0x1ba   :  { %v864_v11 = vpop.f32.mrf.mxu2  ;;  %v884_v13 = vpop.f32.mrf.mxu3 }
 0x1bb   :  { %v865_v12 = vadd.f32 %v864_v11, %v845_v10 }
 0x1bd   :  { %v885_v14 = vadd.f32 %v884_v13, %v865_v12  ;;  %v1275_v12 = vld [vmem:[%s2262_s8 + $0x48] sm:$0xff]  ;;  %v1278_v13 = vld [vmem:[%s2262_s8 + $0x60] sm:$0xff] }
 0x1be   :  { %1329 = vperm.xlu1 %1726, %v1275_v12  }
 0x1bf   :  { %v887_v15 = vmax.f32 %v885_v14, 0.0 }
 0x1c1   :  { %1658 = vmatmul.msk.f32.vlgmr.msra.gmra.mxu0 %vm986_vm1, %v887_v15  ;;  %1659 = vmatmul.msk.f32.vlgmr.msra.gmra.mxu1 %vm986_vm1, %v887_v15 }
 0x1c2   :  { %1660 = vmatmul.msk.f32.vlgmr.msra.gmra.mxu2 %vm986_vm1, %v887_v15  ;;  %1661 = vmatmul.msk.f32.vlgmr.msra.gmra.mxu3 %vm986_vm1, %v887_v15 }
 0x1c6   :  { %1344 = vperm.xlu1 %1726, %v1278_v13  }
 0x1c9   :  { %1662 = vmatmul.msk.f32.vlgmr.msrb.gmra.mxu0 %vm986_vm1, %v887_v15  ;;  %1663 = vmatmul.msk.f32.vlgmr.msrb.gmra.mxu1 %vm986_vm1, %v887_v15 }
 0x1ca   :  { %1664 = vmatmul.msk.f32.vlgmr.msrb.gmra.mxu2 %vm986_vm1, %v887_v15  ;;  %1665 = vmatmul.msk.f32.vlgmr.msrb.gmra.mxu3 %vm986_vm1, %v887_v15 }
 0x23e   :  { %v1007_v19 = vpop.f32.mrf.mxu0  ;;  %v1027_v20 = vpop.f32.mrf.mxu1 }
 0x23f   :  { %v1008_v21 = vadd.f32 %v1007_v19, %v970_v17  ;;  %v1028_v22 = vadd.f32 %v1027_v20, %v971_v18  ;;  %v1246_v17 = vld [vmem:[%s2261_s7] sm:$0xff]  ;;  %v1269_v20 = vld [vmem:[%s2262_s8 + $0x18] sm:$0xff] }
 0x240   :  { %v1254_v18 = vld [vmem:[%s2261_s7 + $0x40] sm:$0xff]  ;;  %1299 = vperm.xlu2 %1727, %v1269_v20  }
 0x241   :  { %v1150_v23 = vmax.f32 %v1008_v21, 0.0  ;;  %v1151_v24 = vmax.f32 %v1028_v22, 0.0  ;;  %v1281_v21 = vld [vmem:[%s2262_s8 + $0x78] sm:$0xff]  ;;  %v1247_v22 = vld [vmem:[%s2261_s7 + $0x8] sm:$0xff] }
 0x242   :  { %1359 = vperm.xlu1 %1726, %v1281_v21  }
 0x243   :  { %1158 = vst [vmem:[#allocation4] sm:$0x1] %v1150_v23  ;;  %v1160_v28 = vrot.slane %v1150_v23, 1  ;;  %v1198_v29 = vrot.slane %v1150_v23, 2  ;;  %v1201_v30 = vrot.slane %v1150_v23, 3  ;;  %v1165_v31 = vrot.slane %v1151_v24, 1 }
 0x244   :  { %1163 = vst [vmem:[#allocation4 + $0x2] sm:$0x1] %v1151_v24  ;;  %v1204_v33 = vrot.slane %v1151_v24, 2  ;;  %v1207_v38 = vrot.slane %v1151_v24, 3  ;;  %v1255_v23 = vld [vmem:[%s2261_s7 + $0x48] sm:$0xff]  ;;  %v1270_v24 = vld [vmem:[%s2262_s8 + $0x20] sm:$0xff] }
 0x245   :  { %1162 = vst [vmem:[#allocation4 + $0x1] sm:$0x1] %v1160_v28  ;;  %v1047_v34 = vpop.f32.mrf.mxu2  ;;  %v1067_v35 = vpop.f32.mrf.mxu3  ;;  %v1273_v28 = vld [vmem:[%s2262_s8 + $0x38] sm:$0xff] }
 0x246   :  { %1200 = vst [vmem:[#allocation4 + $0x8] sm:$0x1] %v1198_v29  ;;  %v1048_v39 = vadd.f32 %v1047_v34, %v972_v25  ;;  %v1068_v40 = vadd.f32 %v1067_v35, %v973_v26  ;;  %v1087_v41 = vpop.f32.mrf.mxu0  ;;  %v1107_v37 = vpop.f32.mrf.mxu1  ;;  %v1248_v25 = vld [vmem:[%s2261_s7 + $0x10] sm:$0xff]  ;;  %v1249_v29 = vld [vmem:[%s2261_s7 + $0x18] sm:$0xff]  ;;  %v1279_v34 = vld [vmem:[%s2262_s8 + $0x68] sm:$0xff] }
 0x247   :  { %1203 = vst [vmem:[#allocation4 + $0x9] sm:$0x1] %v1201_v30  ;;  %v1088_v44 = vadd.f32 %v1087_v41, %v974_v32  ;;  %v1108_v51 = vadd.f32 %v1107_v37, %v975_v45  ;;  %v1256_v26 = vld [vmem:[%s2261_s7 + $0x50] sm:$0xff]  ;;  %v1257_v30 = vld [vmem:[%s2261_s7 + $0x58] sm:$0xff]  ;;  %v1250_v32 = vld [vmem:[%s2261_s7 + $0x20] sm:$0xff] }
 0x248   :  { %1167 = vst [vmem:[#allocation4 + $0x3] sm:$0x1] %v1165_v31  ;;  %v1152_v42 = vmax.f32 %v1048_v39, 0.0  ;;  %v1153_v43 = vmax.f32 %v1068_v40, 0.0  ;;  %1304 = vperm.xlu2 %1727, %v1270_v24   ;;  %v1276_v31 = vld [vmem:[%s2262_s8 + $0x50] sm:$0xff]  ;;  %v1251_v35 = vld [vmem:[%s2261_s7 + $0x28] sm:$0xff] }
 0x249   :  { %1206 = vst [vmem:[#allocation4 + $0xa] sm:$0x1] %v1204_v33  ;;  %v1154_v50 = vmax.f32 %v1088_v44, 0.0  ;;  %v1155_v58 = vmax.f32 %v1108_v51, 0.0  ;;  %v1258_v33 = vld [vmem:[%s2261_s7 + $0x60] sm:$0xff]  ;;  %v1260_v39 = vld [vmem:[%s2261_s7 + $0x70] sm:$0xff] }
 0x24a   :  { %1209 = vst [vmem:[#allocation4 + $0xb] sm:$0x1] %v1207_v38  ;;  %v1170_v46 = vrot.slane %v1152_v42, 1  ;;  %v1210_v47 = vrot.slane %v1152_v42, 2  ;;  %v1213_v48 = vrot.slane %v1152_v42, 3  ;;  %v1175_v49 = vrot.slane %v1153_v43, 1 }
 0x24b   :  { %1168 = vst [vmem:[#allocation4 + $0x4] sm:$0x1] %v1152_v42  ;;  %v1216_v53 = vrot.slane %v1153_v43, 2  ;;  %v1219_v55 = vrot.slane %v1153_v43, 3  ;;  %v1180_v57 = vrot.slane %v1154_v50, 1  ;;  %v1222_v61 = vrot.slane %v1154_v50, 2  ;;  %v1290_v42 = vpop.permute.xlu1 %1289 }
 0x24c   :  { %1172 = vst [vmem:[#allocation4 + $0x5] sm:$0x1] %v1170_v46  ;;  %v1225_v63 = vrot.slane %v1154_v50, 3  ;;  %v1185_v27 = vrot.slane %v1155_v58, 1  ;;  %v1228_v2 = vrot.slane %v1155_v58, 2  ;;  %v1231_v3 = vrot.slane %v1155_v58, 3 }
 0x24d   :  { %1212 = vst [vmem:[#allocation4 + $0xc] sm:$0x1] %v1210_v47  ;;  %v1127_v54 = vpop.f32.mrf.mxu2  ;;  %v1147_v62 = vpop.f32.mrf.mxu3  ;;  %v1252_v38 = vld [vmem:[%s2261_s7 + $0x30] sm:$0xff]  ;;  %v1253_v40 = vld [vmem:[%s2261_s7 + $0x38] sm:$0xff] }
 0x24e   :  { %1215 = vst [vmem:[#allocation4 + $0xd] sm:$0x1] %v1213_v48  ;;  %v1128_v59 = vadd.f32 %v1127_v54, %v976_v52  ;;  %v1148_v1 = vadd.f32 %v1147_v62, %v977_v60  ;;  %v1261_v41 = vld [vmem:[%s2261_s7 + $0x78] sm:$0xff] }
 0x24f   :  { %1173 = vst [vmem:[#allocation4 + $0x6] sm:$0x1] %v1153_v43  ;;  %v1285_v43 = vpop.permute.xlu0 %1284 }
 0x250   :  { %1177 = vst [vmem:[#allocation4 + $0x7] sm:$0x1] %v1175_v49  ;;  %v1156_v0 = vmax.f32 %v1128_v59, 0.0  ;;  %v1157_v6 = vmax.f32 %v1148_v1, 0.0  ;;  %1319 = vperm.xlu2 %1727, %v1273_v28  }
 0x251   :  { %1218 = vst [vmem:[#allocation4 + $0xe] sm:$0x1] %v1216_v53 }
 0x252   :  { %1221 = vst [vmem:[#allocation4 + $0xf] sm:$0x1] %v1219_v55  ;;  %v1190_v5 = vrot.slane %v1156_v0, 1  ;;  %v1234_v7 = vrot.slane %v1156_v0, 2  ;;  %v1237_v8 = vrot.slane %v1156_v0, 3  ;;  %v1195_v9 = vrot.slane %v1157_v6, 1 }
 0x253   :  { %1178 = vst [vmem:[#allocation4 + $0x10] sm:$0x1] %v1154_v50  ;;  %v1240_v10 = vrot.slane %v1157_v6, 2  ;;  %v1243_v11 = vrot.slane %v1157_v6, 3  ;;  %v1295_v45 = vpop.permute.xlu1 %1294 }
 0x254   :  { %1182 = vst [vmem:[#allocation4 + $0x11] sm:$0x1] %v1180_v57 }
 0x255   :  { %1224 = vst [vmem:[#allocation4 + $0x18] sm:$0x1] %v1222_v61 }
 0x256   :  { %1227 = vst [vmem:[#allocation4 + $0x19] sm:$0x1] %v1225_v63 }
 0x257   :  { %1183 = vst [vmem:[#allocation4 + $0x12] sm:$0x1] %v1155_v58  ;;  %v1262_v16 = vld [vmem:[#allocation4] sm:$0xff]  ;;  %v2142_v37 = vpop.permute.xlu0 %1309 }
 0x258   :  { %1187 = vst [vmem:[#allocation4 + $0x13] sm:$0x1] %v1185_v27  ;;  %1334 = vperm.xlu2 %1727, %v1276_v31  }
 0x259   :  { %1230 = vst [vmem:[#allocation4 + $0x1a] sm:$0x1] %v1228_v2  ;;  %v1263_v19 = vld [vmem:[#allocation4 + $0x8] sm:$0xff] }
 0x25a   :  { %1233 = vst [vmem:[#allocation4 + $0x1b] sm:$0x1] %v1231_v3 }
 0x25b   :  { %1188 = vst [vmem:[#allocation4 + $0x14] sm:$0x1] %v1156_v0  ;;  %v2146_v53 = vpop.permute.xlu1 %1314 }
 0x25c   :  { %1192 = vst [vmem:[#allocation4 + $0x15] sm:$0x1] %v1190_v5 }
 0x25d   :  { %1236 = vst [vmem:[#allocation4 + $0x1c] sm:$0x1] %v1234_v7 }
 0x25e   :  { %1239 = vst [vmem:[#allocation4 + $0x1d] sm:$0x1] %v1237_v8 }
 0x25f   :  { %1193 = vst [vmem:[#allocation4 + $0x16] sm:$0x1] %v1157_v6  ;;  %v1325_v54 = vpop.permute.xlu0 %1324 }
 0x260   :  { %1197 = vst [vmem:[#allocation4 + $0x17] sm:$0x1] %v1195_v9  ;;  %1349 = vperm.xlu2 %1727, %v1279_v34  }
 0x261   :  { %1242 = vst [vmem:[#allocation4 + $0x1e] sm:$0x1] %v1240_v10 }
 0x262   :  { %1245 = vst [vmem:[#allocation4 + $0x1f] sm:$0x1] %v1243_v11 }
 0x263   :  { %v1330_v3 = vpop.permute.xlu1 %1329 }
 0x267   :  { %v1264_v14 = vld [vmem:[#allocation4 + $0x10] sm:$0xff] }
 0x268   :  { %1425 = vmatpush.msra.mxu0 %v1264_v14  ;;  %1714 = vmatpush.msra.mxu2 %v1264_v14 }
 0x269   :  { %v1265_v15 = vld [vmem:[#allocation4 + $0x18] sm:$0xff] }
 0x26a   :  { %1490 = vmatpush.msra.mxu1 %v1265_v15  ;;  %1716 = vmatpush.msra.mxu3 %v1265_v15 }
 0x26b   :  { %1426 = vmatpush.msra.mxu0 %v1262_v16  ;;  %1715 = vmatpush.msra.mxu2 %v1262_v16 }
 0x26c   :  { %1491 = vmatpush.msra.mxu1 %v1263_v19  ;;  %1717 = vmatpush.msra.mxu3 %v1263_v19 }
 0x26d   :  { %1666 = vmatmul.msk.f32.vlgmr.msra.gmra.mxu0 %vm1362_vm2, %v1246_v17  ;;  %1674 = vmatmul.msk.f32.vlgmr.msra.gmra.mxu2 %vm1362_vm2, %v1254_v18 }
 0x26e   :  { %1682 = vmatmul.msk.f32.vlgmr.msra.gmra.mxu1 %vm1362_vm2, %v1246_v17  ;;  %1690 = vmatmul.msk.f32.vlgmr.msra.gmra.mxu3 %vm1362_vm2, %v1254_v18 }
 0x275   :  { %1667 = vmatmul.msk.f32.gmra.mxu0 %vm1362_vm2, %v1247_v22  ;;  %1675 = vmatmul.msk.f32.gmra.mxu2 %vm1362_vm2, %v1255_v23 }
 0x276   :  { %1683 = vmatmul.msk.f32.gmra.mxu1 %vm1362_vm2, %v1247_v22  ;;  %1691 = vmatmul.msk.f32.gmra.mxu3 %vm1362_vm2, %v1255_v23 }
 0x27d   :  { %1668 = vmatmul.msk.f32.gmra.mxu0 %vm1362_vm2, %v1248_v25  ;;  %1676 = vmatmul.msk.f32.gmra.mxu2 %vm1362_vm2, %v1256_v26 }
 0x27e   :  { %1684 = vmatmul.msk.f32.gmra.mxu1 %vm1362_vm2, %v1248_v25  ;;  %1692 = vmatmul.msk.f32.gmra.mxu3 %vm1362_vm2, %v1256_v26 }
 0x285   :  { %1669 = vmatmul.msk.f32.gmra.mxu0 %vm1362_vm2, %v1249_v29  ;;  %1677 = vmatmul.msk.f32.gmra.mxu2 %vm1362_vm2, %v1257_v30 }
 0x286   :  { %1685 = vmatmul.msk.f32.gmra.mxu1 %vm1362_vm2, %v1249_v29  ;;  %1693 = vmatmul.msk.f32.gmra.mxu3 %vm1362_vm2, %v1257_v30  ;;  %v1340_v30 = vpop.permute.xlu0 %1339 }
 0x28d   :  { %1670 = vmatmul.msk.f32.gmra.mxu0 %vm1362_vm2, %v1250_v32  ;;  %1678 = vmatmul.msk.f32.gmra.mxu2 %vm1362_vm2, %v1258_v33 }
 0x28e   :  { %1686 = vmatmul.msk.f32.gmra.mxu1 %vm1362_vm2, %v1250_v32  ;;  %1694 = vmatmul.msk.f32.gmra.mxu3 %vm1362_vm2, %v1258_v33 }
 0x295   :  { %1671 = vmatmul.msk.f32.gmra.mxu0 %vm1362_vm2, %v1251_v35  ;;  %1679 = vmatmul.msk.f32.gmra.mxu2 %vm1362_vm2, %v1259_v36 }
 0x296   :  { %1687 = vmatmul.msk.f32.gmra.mxu1 %vm1362_vm2, %v1251_v35  ;;  %1695 = vmatmul.msk.f32.gmra.mxu3 %vm1362_vm2, %v1259_v36 }
 0x29a   :  { %v1300_v44 = vpop.permute.xlu2 %1299 }
 0x29d   :  { %1672 = vmatmul.msk.f32.gmra.mxu0 %vm1362_vm2, %v1252_v38  ;;  %1680 = vmatmul.msk.f32.gmra.mxu2 %vm1362_vm2, %v1260_v39 }
 0x29e   :  { %1688 = vmatmul.msk.f32.gmra.mxu1 %vm1362_vm2, %v1252_v38  ;;  %1696 = vmatmul.msk.f32.gmra.mxu3 %vm1362_vm2, %v1260_v39 }
 0x2a2   :  { %v2144_v47 = vpop.permute.xlu2 %1304 }
 0x2a5   :  { %1673 = vmatmul.msk.f32.gmra.mxu0 %vm1362_vm2, %v1253_v40  ;;  %1681 = vmatmul.msk.f32.gmra.mxu2 %vm1362_vm2, %v1261_v41 }
 0x2a6   :  { %1689 = vmatmul.msk.f32.gmra.mxu1 %vm1362_vm2, %v1253_v40  ;;  %1697 = vmatmul.msk.f32.gmra.mxu3 %vm1362_vm2, %v1261_v41 }
 0x2aa   :  { %v2154_v0 = vpop.permute.xlu2 %1319 }
 0x2b2   :  { %v1335_v16 = vpop.permute.xlu2 %1334 }
 0x2ea   :  { %v1428_v46 = vpop.f32.mrf.mxu0 }
 0x2eb   :  { %v1429_v48 = vadd.f32 %v1428_v46, %v1285_v43  ;;  %v1493_v49 = vpop.f32.mrf.mxu1 }
 0x2ec   :  { %v1494_v50 = vadd.f32 %v1493_v49, %v1285_v43 }
 0x2ed   :  { %v1541_v51 = vmax.f32 %v1429_v48, 0.0 }
 0x2ee   :  { %v1542_v52 = vmax.f32 %v1494_v50, 0.0 }
 0x2ef   :  { %1573 = vst [vmem:[%s2263_s9] sm:$0xff] %v1541_v51 }
 0x2f0   :  { %1698 = vst [vmem:[%s2263_s9 + $0x80] sm:$0xff] %v1542_v52  ;;  %v1452_v55 = vpop.f32.mrf.mxu2 }
 0x2f1   :  { %v1453_v56 = vadd.f32 %v1452_v55, %v1325_v54  ;;  %v1517_v57 = vpop.f32.mrf.mxu3 }
 0x2f2   :  { %v1518_v58 = vadd.f32 %v1517_v57, %v1325_v54  ;;  %v1431_v59 = vpop.f32.mrf.mxu0 }
 0x2f3   :  { %v1557_v60 = vmax.f32 %v1453_v56, 0.0  ;;  %v1432_v61 = vadd.f32 %v1431_v59, %v1290_v42  ;;  %v1496_v62 = vpop.f32.mrf.mxu1 }
 0x2f4   :  { %v1558_v63 = vmax.f32 %v1518_v58, 0.0  ;;  %v1497_v27 = vadd.f32 %v1496_v62, %v1290_v42  ;;  %v1350_v58 = vpop.permute.xlu2 %1349 }
 0x2f5   :  { %1581 = vst [vmem:[%s2263_s9 + $0x40] sm:$0xff] %v1557_v60  ;;  %v1543_v1 = vmax.f32 %v1432_v61, 0.0 }
 0x2f6   :  { %1706 = vst [vmem:[%s2263_s9 + $0xc0] sm:$0xff] %v1558_v63  ;;  %v1544_v2 = vmax.f32 %v1497_v27, 0.0 }
 0x2f7   :  { %1574 = vst [vmem:[%s2263_s9 + $0x8] sm:$0xff] %v1543_v1 }
 0x2f8   :  { %1699 = vst [vmem:[%s2263_s9 + $0x88] sm:$0xff] %v1544_v2  ;;  %v1455_v4 = vpop.f32.mrf.mxu2 }
 0x2f9   :  { %v1456_v5 = vadd.f32 %v1455_v4, %v1330_v3  ;;  %v1520_v6 = vpop.f32.mrf.mxu3 }
 0x2fa   :  { %v1521_v7 = vadd.f32 %v1520_v6, %v1330_v3  ;;  %v1434_v8 = vpop.f32.mrf.mxu0  ;;  %v1355_v6 = vpop.permute.xlu0 %1354 }
 0x2fb   :  { %v1559_v9 = vmax.f32 %v1456_v5, 0.0  ;;  %v1435_v10 = vadd.f32 %v1434_v8, %v1295_v45  ;;  %v1499_v11 = vpop.f32.mrf.mxu1 }
 0x2fc   :  { %v1560_v12 = vmax.f32 %v1521_v7, 0.0  ;;  %v1500_v13 = vadd.f32 %v1499_v11, %v1295_v45 }
 0x2fd   :  { %1582 = vst [vmem:[%s2263_s9 + $0x48] sm:$0xff] %v1559_v9  ;;  %v1545_v14 = vmax.f32 %v1435_v10, 0.0 }
 0x2fe   :  { %1707 = vst [vmem:[%s2263_s9 + $0xc8] sm:$0xff] %v1560_v12  ;;  %v1546_v15 = vmax.f32 %v1500_v13, 0.0 }
 0x2ff   :  { %1575 = vst [vmem:[%s2263_s9 + $0x10] sm:$0xff] %v1545_v14 }
 0x300   :  { %1700 = vst [vmem:[%s2263_s9 + $0x90] sm:$0xff] %v1546_v15  ;;  %v1458_v17 = vpop.f32.mrf.mxu2 }
 0x301   :  { %v1523_v18 = vpop.f32.mrf.mxu3  ;;  %v1459_v19 = vadd.f32 %v1458_v17, %v1335_v16 }
 0x302   :  { %v1437_v20 = vpop.f32.mrf.mxu0  ;;  %v1524_v21 = vadd.f32 %v1523_v18, %v1335_v16 }
 0x303   :  { %v1438_v22 = vadd.f32 %v1437_v20, %v1300_v44  ;;  %v1502_v23 = vpop.f32.mrf.mxu1  ;;  %v1561_v24 = vmax.f32 %v1459_v19, 0.0 }
 0x304   :  { %v1503_v25 = vadd.f32 %v1502_v23, %v1300_v44  ;;  %v1562_v26 = vmax.f32 %v1524_v21, 0.0  ;;  %v1345_v44 = vpop.permute.xlu1 %1344 }
 0x305   :  { %v1547_v28 = vmax.f32 %v1438_v22, 0.0  ;;  %1583 = vst [vmem:[%s2263_s9 + $0x50] sm:$0xff] %v1561_v24 }
 0x306   :  { %v1548_v29 = vmax.f32 %v1503_v25, 0.0  ;;  %1708 = vst [vmem:[%s2263_s9 + $0xd0] sm:$0xff] %v1562_v26 }
 0x307   :  { %1576 = vst [vmem:[%s2263_s9 + $0x18] sm:$0xff] %v1547_v28 }
 0x308   :  { %1701 = vst [vmem:[%s2263_s9 + $0x98] sm:$0xff] %v1548_v29  ;;  %v1461_v31 = vpop.f32.mrf.mxu2 }
 0x309   :  { %v1462_v32 = vadd.f32 %v1461_v31, %v1340_v30  ;;  %v1526_v33 = vpop.f32.mrf.mxu3 }
 0x30a   :  { %v1527_v34 = vadd.f32 %v1526_v33, %v1340_v30  ;;  %v1440_v35 = vpop.f32.mrf.mxu0 }
 0x30b   :  { %v1563_v36 = vmax.f32 %v1462_v32, 0.0  ;;  %v1441_v38 = vadd.f32 %v1440_v35, %v2144_v47  ;;  %v1505_v39 = vpop.f32.mrf.mxu1 }
 0x30c   :  { %v1564_v40 = vmax.f32 %v1527_v34, 0.0  ;;  %v1506_v41 = vadd.f32 %v1505_v39, %v2144_v47  ;;  %v1360_v18 = vpop.permute.xlu1 %1359 }
 0x30d   :  { %1584 = vst [vmem:[%s2263_s9 + $0x58] sm:$0xff] %v1563_v36  ;;  %v1549_v42 = vmax.f32 %v1441_v38, 0.0 }
 0x30e   :  { %1709 = vst [vmem:[%s2263_s9 + $0xd8] sm:$0xff] %v1564_v40  ;;  %v1550_v43 = vmax.f32 %v1506_v41, 0.0 }
 0x30f   :  { %1577 = vst [vmem:[%s2263_s9 + $0x20] sm:$0xff] %v1549_v42 }
 0x310   :  { %1702 = vst [vmem:[%s2263_s9 + $0xa0] sm:$0xff] %v1550_v43  ;;  %v1464_v45 = vpop.f32.mrf.mxu2 }
 0x311   :  { %v1465_v46 = vadd.f32 %v1464_v45, %v1345_v44  ;;  %v1529_v47 = vpop.f32.mrf.mxu3 }
 0x312   :  { %v1530_v48 = vadd.f32 %v1529_v47, %v1345_v44  ;;  %v1443_v49 = vpop.f32.mrf.mxu0 }
 0x313   :  { %v1565_v50 = vmax.f32 %v1465_v46, 0.0  ;;  %v1444_v51 = vadd.f32 %v1443_v49, %v2142_v37  ;;  %v1508_v52 = vpop.f32.mrf.mxu1 }
 0x314   :  { %v1566_v54 = vmax.f32 %v1530_v48, 0.0  ;;  %v1509_v55 = vadd.f32 %v1508_v52, %v2142_v37 }
 0x315   :  { %1585 = vst [vmem:[%s2263_s9 + $0x60] sm:$0xff] %v1565_v50  ;;  %v1551_v56 = vmax.f32 %v1444_v51, 0.0 }
 0x316   :  { %1710 = vst [vmem:[%s2263_s9 + $0xe0] sm:$0xff] %v1566_v54  ;;  %v1552_v57 = vmax.f32 %v1509_v55, 0.0 }
 0x317   :  { %1578 = vst [vmem:[%s2263_s9 + $0x28] sm:$0xff] %v1551_v56 }
 0x318   :  { %1703 = vst [vmem:[%s2263_s9 + $0xa8] sm:$0xff] %v1552_v57  ;;  %v1467_v37 = vpop.f32.mrf.mxu2 }
 0x319   :  { %v1468_v59 = vadd.f32 %v1467_v37, %v1350_v58  ;;  %v1532_v60 = vpop.f32.mrf.mxu3 }
 0x31a   :  { %v1533_v61 = vadd.f32 %v1532_v60, %v1350_v58  ;;  %v1446_v62 = vpop.f32.mrf.mxu0 }
 0x31b   :  { %v1567_v63 = vmax.f32 %v1468_v59, 0.0  ;;  %v1447_v27 = vadd.f32 %v1446_v62, %v2146_v53  ;;  %v1511_v1 = vpop.f32.mrf.mxu1 }
 0x31c   :  { %v1568_v2 = vmax.f32 %v1533_v61, 0.0  ;;  %v1512_v3 = vadd.f32 %v1511_v1, %v2146_v53 }
 0x31d   :  { %1586 = vst [vmem:[%s2263_s9 + $0x68] sm:$0xff] %v1567_v63  ;;  %v1553_v4 = vmax.f32 %v1447_v27, 0.0 }
 0x31e   :  { %1711 = vst [vmem:[%s2263_s9 + $0xe8] sm:$0xff] %v1568_v2  ;;  %v1554_v5 = vmax.f32 %v1512_v3, 0.0 }
 0x31f   :  { %1579 = vst [vmem:[%s2263_s9 + $0x30] sm:$0xff] %v1553_v4 }
 0x320   :  { %1704 = vst [vmem:[%s2263_s9 + $0xb0] sm:$0xff] %v1554_v5  ;;  %v1470_v53 = vpop.f32.mrf.mxu2 }
 0x321   :  { %v1471_v7 = vadd.f32 %v1470_v53, %v1355_v6  ;;  %v1535_v8 = vpop.f32.mrf.mxu3 }
 0x322   :  { %v1536_v9 = vadd.f32 %v1535_v8, %v1355_v6  ;;  %v1449_v10 = vpop.f32.mrf.mxu0 }
 0x323   :  { %v1569_v11 = vmax.f32 %v1471_v7, 0.0  ;;  %v1450_v12 = vadd.f32 %v1449_v10, %v2154_v0  ;;  %v1514_v13 = vpop.f32.mrf.mxu1 }
 0x324   :  { %v1570_v14 = vmax.f32 %v1536_v9, 0.0  ;;  %v1515_v15 = vadd.f32 %v1514_v13, %v2154_v0 }
 0x325   :  { %1587 = vst [vmem:[%s2263_s9 + $0x70] sm:$0xff] %v1569_v11  ;;  %v1555_v16 = vmax.f32 %v1450_v12, 0.0 }
 0x326   :  { %1712 = vst [vmem:[%s2263_s9 + $0xf0] sm:$0xff] %v1570_v14  ;;  %v1556_v17 = vmax.f32 %v1515_v15, 0.0 }
 0x327   :  { %1580 = vst [vmem:[%s2263_s9 + $0x38] sm:$0xff] %v1555_v16 }
 0x328   :  { %1705 = vst [vmem:[%s2263_s9 + $0xb8] sm:$0xff] %v1556_v17  ;;  %v1473_v0 = vpop.f32.mrf.mxu2 }
 0x329   :  { %v1474_v19 = vadd.f32 %v1473_v0, %v1360_v18  ;;  %v1538_v20 = vpop.f32.mrf.mxu3 }
 0x32a   :  { %v1539_v21 = vadd.f32 %v1538_v20, %v1360_v18 }
 0x32b   :  { %v1571_v22 = vmax.f32 %v1474_v19, 0.0 }
 0x32c   :  { %v1572_v23 = vmax.f32 %v1539_v21, 0.0 }
 0x32d   :  { %1588 = vst [vmem:[%s2263_s9 + $0x78] sm:$0xff] %v1571_v22 }
 0x32e   :  { %1713 = vst [vmem:[%s2263_s9 + $0xf8] sm:$0xff] %v1572_v23 }
 0x32f   :  { %1610 = vsyncpa [#allocation6], 1 }
 0x330   :  { %1611 = vsyncpa [#allocation8], 1 }

</bundles_post_ra>
